<compile_context>
chip_gen: v5e
topology: v5e:2x2
jax: 0.10.0
libtpu: 0.0.40
codegen_flags: <defaults>
</compile_context>

<pallas_src>
import math
import jax
import jax.numpy as jnp
from jax.experimental import pallas as pl
from jax.experimental.pallas import tpu as pltpu

# Small synthetic BERT config (real module: emb_dim=768, 12 layers, seq<=20).
B, S, H = 2, 16, 32          # batch, seq, hidden
NH, HD = 4, 8                # heads, head dim (NH * HD == H)
INTER = 64                   # FFN intermediate dim
LAYERS = 2
VOCAB = 128
F32 = jnp.float32


# ----------------------------- in-kernel helpers -----------------------------

def _layernorm(x, g, b, eps=1e-12):
    mu = jnp.mean(x, axis=-1, keepdims=True)
    var = jnp.mean((x - mu) ** 2, axis=-1, keepdims=True)
    return (x - mu) * jax.lax.rsqrt(var + eps) * g + b


def _gelu(x):
    # tanh approximation (HF BERT default is the erf-based gelu; numerics differ slightly).
    c = math.sqrt(2.0 / math.pi)
    return 0.5 * x * (1.0 + jnp.tanh(c * (x + 0.044715 * x * x * x)))


# ----------------------------- fused encoder kernel ---------------------------
# bvec rows: [bo, ln1_g, ln1_b, b_ffn2, ln2_g, ln2_b]

def encoder_kernel(x_emb_ref, mask_ref, embln_ref,
                   wqkv_ref, bqkv_ref, wo_ref, wff1_ref, b1_ref, wff2_ref, bvec_ref,
                   x_out_ref, cls_ref,
                   xs_ref):
    l = pl.program_id(0)
    embln = embln_ref[...]                                   # (2, H)

    # Fold embedding LayerNorm into layer 0; hidden state lives in VMEM scratch.
    @pl.when(l == 0)
    def _():
        emb2 = x_emb_ref[...].reshape(B * S, H)
        xs_ref[...] = _layernorm(emb2, embln[0:1], embln[1:2])

    x2 = xs_ref[...]                                         # (B*S, H)
    mask = mask_ref[...]                                     # (B, 1, S) additive
    bvec = bvec_ref[0]                                       # (6, H)
    scale = 1.0 / math.sqrt(HD)

    # --- fused QKV projection: one full-width MXU matmul ---
    qkv = jnp.dot(x2, wqkv_ref[0], preferred_element_type=F32) + bqkv_ref[0]   # (B*S, 3H)
    qkv = qkv.reshape(B, S, 3 * H)

    ctx_heads = []
    cls_acc = jnp.zeros((B, S), F32)
    for h in range(NH):                                      # static, small head loop
        qh = qkv[:, :, h * HD:(h + 1) * HD]                  # (B, S, HD)
        kh = qkv[:, :, H + h * HD:H + (h + 1) * HD]
        vh = qkv[:, :, 2 * H + h * HD:2 * H + (h + 1) * HD]
        s = jnp.einsum('bqd,bkd->bqk', qh, kh,
                       preferred_element_type=F32) * scale + mask   # (B, S, S)
        s = s - jnp.max(s, axis=-1, keepdims=True)
        e = jnp.exp(s)
        p = e * pl.reciprocal(jnp.sum(e, axis=-1, keepdims=True), approx=True)
        cls_acc = cls_acc + p[:, 0, :]                       # CLS row, summed over heads
        ctx_heads.append(jnp.einsum('bqk,bkd->bqd', p, vh,
                                    preferred_element_type=F32))    # (B, S, HD)

    ctx = jnp.concatenate(ctx_heads, axis=-1).reshape(B * S, H)

    # --- single output projection + residual/LN ---
    attn_out = jnp.dot(ctx, wo_ref[0], preferred_element_type=F32) + bvec[0:1]
    h1 = _layernorm(x2 + attn_out, bvec[1:2], bvec[2:3])

    # --- FFN on the (B*S, H) slab ---
    ff = _gelu(jnp.dot(h1, wff1_ref[0], preferred_element_type=F32) + b1_ref[0])
    ff = jnp.dot(ff, wff2_ref[0], preferred_element_type=F32) + bvec[3:4]
    x_new = _layernorm(h1 + ff, bvec[4:5], bvec[5:6])        # (B*S, H)
    xs_ref[...] = x_new

    # Only the last layer's hidden state and CLS attention row leave the chip.
    @pl.when(l == pl.num_programs(0) - 1)
    def _():
        x_out_ref[...] = x_new.reshape(B, S, H)
        cls_ref[...] = cls_acc * (1.0 / NH)


def encoder_stack(x_emb, add_mask, params):
    lmap3 = lambda l: (l, 0, 0)
    const3 = lambda l: (0, 0, 0)
    const2 = lambda l: (0, 0)
    out_shapes = (jax.ShapeDtypeStruct((B, S, H), F32),
                  jax.ShapeDtypeStruct((B, S), F32))
    return pl.pallas_call(
        encoder_kernel,
        out_shape=out_shapes,
        grid_spec=pltpu.PrefetchScalarGridSpec(
            num_scalar_prefetch=0,
            grid=(LAYERS,),
            in_specs=[
                pl.BlockSpec((B, S, H), const3),             # embeddings (resident)
                pl.BlockSpec((B, 1, S), const3),             # additive attention mask
                pl.BlockSpec((2, H), const2),                # embedding LN params
                pl.BlockSpec((1, H, 3 * H), lmap3),          # fused Wqkv, per layer
                pl.BlockSpec((1, 1, 3 * H), lmap3),          # fused bqkv
                pl.BlockSpec((1, H, H), lmap3),              # Wo
                pl.BlockSpec((1, H, INTER), lmap3),          # W_ffn1
                pl.BlockSpec((1, 1, INTER), lmap3),          # b_ffn1
                pl.BlockSpec((1, INTER, H), lmap3),          # W_ffn2
                pl.BlockSpec((1, 6, H), lmap3),              # packed bo/ln1/b2/ln2
            ],
            out_specs=(pl.BlockSpec((B, S, H), const3),
                       pl.BlockSpec((B, S), const2)),
            scratch_shapes=[pltpu.VMEM((B * S, H), F32)],    # carried hidden state
        ),
        compiler_params=pltpu.CompilerParams(
            dimension_semantics=("arbitrary",)),
    )(x_emb, add_mask, params["emb_ln"],
      params["wqkv"], params["bqkv"], params["wo"],
      params["wff1"], params["b1"], params["wff2"], params["bvec"])


# ----------------------------- parameters -------------------------------------

def init_params(key):
    keys = jax.random.split(key, 4)

    def nrm(k, shape, scale=0.02):
        return (scale * jax.random.normal(k, shape)).astype(F32)

    params = dict(
        word_emb=nrm(keys[0], (VOCAB, H)),
        pos_emb=nrm(keys[1], (S, H)),
        tok_emb=nrm(keys[2], (2, H)),
        emb_ln=jnp.concatenate([jnp.ones((1, H), F32),
                                jnp.zeros((1, H), F32)], axis=0),   # [gamma; beta]
    )

    wqkv, wo, wff1, wff2 = [], [], [], []
    lkeys = jax.random.split(keys[3], LAYERS)
    for l in range(LAYERS):
        k = jax.random.split(lkeys[l], 6)
        wq, wk, wv = nrm(k[0], (H, H)), nrm(k[1], (H, H)), nrm(k[2], (H, H))
        wqkv.append(jnp.concatenate([wq, wk, wv], axis=1))   # (H, 3H)
        wo.append(nrm(k[3], (H, H)))
        wff1.append(nrm(k[4], (H, INTER)))
        wff2.append(nrm(k[5], (INTER, H)))

    # packed per-layer vectors: [bo, ln1_gamma, ln1_beta, b_ffn2, ln2_gamma, ln2_beta]
    bvec_one = jnp.stack([jnp.zeros(H), jnp.ones(H), jnp.zeros(H),
                          jnp.zeros(H), jnp.ones(H), jnp.zeros(H)]).astype(F32)
    params.update(
        wqkv=jnp.stack(wqkv),                                # (L, H, 3H)
        bqkv=jnp.zeros((LAYERS, 1, 3 * H), F32),
        wo=jnp.stack(wo),                                    # (L, H, H)
        wff1=jnp.stack(wff1),                                # (L, H, INTER)
        b1=jnp.zeros((LAYERS, 1, INTER), F32),
        wff2=jnp.stack(wff2),                                # (L, INTER, H)
        bvec=jnp.tile(bvec_one[None], (LAYERS, 1, 1)),       # (L, 6, H)
    )
    return params


# ----------------------------- forward (module semantics) ---------------------

@jax.jit
def text_encoder_forward(params, ids, attn_mask, token_type):
    # TODO(synk): BertTokenizer (string -> ids) is host-side string processing; ids are taken directly.
    we = jnp.take(params["word_emb"], ids, axis=0)                 # (B, S, H)
    pe = params["pos_emb"][None, : ids.shape[1]]                   # (1, S, H)
    te = jnp.take(params["tok_emb"], token_type, axis=0)           # (B, S, H)
    x_emb = (we + pe + te).astype(F32)

    # additive attention mask, computed once in the wrapper
    add_mask = ((1.0 - attn_mask.astype(F32)) * -10000.0)[:, None, :]   # (B, 1, S)

    x_out, cls_attn = encoder_stack(x_emb, add_mask, params)
    # outputs.attentions[-1][:, :, 0, 1:].mean(dim=1)
    last_layer_attn = cls_attn[:, 1:]                              # (B, S-1)

    all_feat = x_out[:, None]                                      # unsqueeze(1): (B, 1, S, H)
    # TODO(synk): aggregate_tokens needs host-side word-piece string merging; treated as identity.
    all_feat = all_feat[:, 0]                                      # last_n_layers == 1
    report_feat = all_feat[:, 0]                                   # (B, H)
    word_feat = all_feat[:, 1:]                                    # (B, S-1, H)
    sents = None                                                   # strings: not representable on device
    return report_feat, word_feat, last_layer_attn, sents


# ----------------------------- main -------------------------------------------

if __name__ == "__main__":
    key = jax.random.PRNGKey(0)
    pkey, ikey = jax.random.split(key)
    params = init_params(pkey)

    ids = jax.random.randint(ikey, (B, S), 0, VOCAB, dtype=jnp.int32)
    attn_mask = jnp.ones((B, S), jnp.int32)
    token_type = jnp.zeros((B, S), jnp.int32)

    report_feat, word_feat, last_atten_pt, sents = text_encoder_forward(
        params, ids, attn_mask, token_type)
    jax.block_until_ready((report_feat, word_feat, last_atten_pt))

    assert report_feat.shape == (B, H)
    assert word_feat.shape == (B, S - 1, H)
    assert last_atten_pt.shape == (B, S - 1)
    assert jnp.all(jnp.isfinite(report_feat))
    assert jnp.all(jnp.isfinite(last_atten_pt))
    print("KERNEL_OK")
</pallas_src>

<mosaic_0001>
module attributes {stable_mosaic.version = 11 : i64} {
  func.func @encoder_kernel(%arg0: i32, %arg1: memref<2x16x32xf32, #tpu.memory_space<vmem>>, %arg2: memref<2x1x16xf32, #tpu.memory_space<vmem>>, %arg3: memref<2x32xf32, #tpu.memory_space<vmem>>, %arg4: memref<1x32x96xf32, #tpu.memory_space<vmem>>, %arg5: memref<1x1x96xf32, #tpu.memory_space<vmem>>, %arg6: memref<1x32x32xf32, #tpu.memory_space<vmem>>, %arg7: memref<1x32x64xf32, #tpu.memory_space<vmem>>, %arg8: memref<1x1x64xf32, #tpu.memory_space<vmem>>, %arg9: memref<1x64x32xf32, #tpu.memory_space<vmem>>, %arg10: memref<1x6x32xf32, #tpu.memory_space<vmem>>, %arg11: memref<2x16x32xf32, #tpu.memory_space<vmem>>, %arg12: memref<2x16xf32, #tpu.memory_space<vmem>>, %arg13: memref<32x32xf32, #tpu.memory_space<vmem>>) attributes {dimension_semantics = [#tpu.dimension_semantics<arbitrary>], iteration_bounds = array<i64: 2>, scalar_prefetch = 0 : i64, scratch_operands = 1 : i64, tpu.core_type = #tpu.core_type<tc>, window_params = [{pipeline_mode = #tpu.pipeline_mode<synchronous>, transform_indices = @transform_0, window_bounds = array<i64: 2, 16, 32>}, {pipeline_mode = #tpu.pipeline_mode<synchronous>, transform_indices = @transform_1, window_bounds = array<i64: 2, 1, 16>}, {pipeline_mode = #tpu.pipeline_mode<synchronous>, transform_indices = @transform_2, window_bounds = array<i64: 2, 32>}, {transform_indices = @transform_3, window_bounds = array<i64: 1, 32, 96>}, {transform_indices = @transform_4, window_bounds = array<i64: 1, 1, 96>}, {transform_indices = @transform_5, window_bounds = array<i64: 1, 32, 32>}, {transform_indices = @transform_6, window_bounds = array<i64: 1, 32, 64>}, {transform_indices = @transform_7, window_bounds = array<i64: 1, 1, 64>}, {transform_indices = @transform_8, window_bounds = array<i64: 1, 64, 32>}, {transform_indices = @transform_9, window_bounds = array<i64: 1, 6, 32>}, {pipeline_mode = #tpu.pipeline_mode<synchronous>, transform_indices = @transform_10, window_bounds = array<i64: 2, 16, 32>}, {pipeline_mode = #tpu.pipeline_mode<synchronous>, transform_indices = @transform_11, window_bounds = array<i64: 2, 16>}]} {
    %c0 = arith.constant 0 : index
    %c0_0 = arith.constant 0 : index
    %0 = vector.load %arg3[%c0, %c0_0] : memref<2x32xf32, #tpu.memory_space<vmem>>, vector<2x32xf32>
    %c0_i32 = arith.constant 0 : i32
    %1 = arith.cmpi eq, %arg0, %c0_i32 : i32
    %2 = arith.extui %1 : i1 to i32
    %c0_i32_1 = arith.constant 0 : i32
    %3 = arith.cmpi ne, %2, %c0_i32_1 : i32
    scf.if %3 {
      %c0_69 = arith.constant 0 : index
      %c0_70 = arith.constant 0 : index
      %c0_71 = arith.constant 0 : index
      %193 = vector.load %arg1[%c0_69, %c0_70, %c0_71] : memref<2x16x32xf32, #tpu.memory_space<vmem>>, vector<2x16x32xf32>
      %194 = vector.shape_cast %193 : vector<2x16x32xf32> to vector<32x32xf32>
      %195 = vector.extract_strided_slice %0 {offsets = [0, 0], sizes = [1, 32], strides = [1, 1]} : vector<2x32xf32> to vector<1x32xf32>
      %196 = vector.extract_strided_slice %0 {offsets = [1, 0], sizes = [1, 32], strides = [1, 1]} : vector<2x32xf32> to vector<1x32xf32>
      %cst_72 = arith.constant dense<0.000000e+00> : vector<32xf32>
      %197 = vector.multi_reduction <add>, %194, %cst_72 [1] : vector<32x32xf32> to vector<32xf32>
      %198 = vector.shape_cast %197 : vector<32xf32> to vector<32x1xf32>
      %cst_73 = arith.constant 3.200000e+01 : f32
      %199 = vector.broadcast %cst_73 : f32 to vector<32x1xf32>
      %200 = arith.divf %198, %199 : vector<32x1xf32>
      %201 = vector.broadcast %200 : vector<32x1xf32> to vector<32x32xf32>
      %202 = arith.subf %194, %201 : vector<32x32xf32>
      %203 = arith.mulf %202, %202 : vector<32x32xf32>
      %cst_74 = arith.constant dense<0.000000e+00> : vector<32xf32>
      %204 = vector.multi_reduction <add>, %203, %cst_74 [1] : vector<32x32xf32> to vector<32xf32>
      %205 = vector.shape_cast %204 : vector<32xf32> to vector<32x1xf32>
      %cst_75 = arith.constant 3.200000e+01 : f32
      %206 = vector.broadcast %cst_75 : f32 to vector<32x1xf32>
      %207 = arith.divf %205, %206 : vector<32x1xf32>
      %208 = vector.broadcast %200 : vector<32x1xf32> to vector<32x32xf32>
      %209 = arith.subf %194, %208 : vector<32x32xf32>
      %cst_76 = arith.constant 9.99999996E-13 : f32
      %210 = vector.broadcast %cst_76 : f32 to vector<32x1xf32>
      %211 = arith.addf %207, %210 : vector<32x1xf32>
      %212 = math.rsqrt %211 : vector<32x1xf32>
      %213 = vector.broadcast %212 : vector<32x1xf32> to vector<32x32xf32>
      %214 = arith.mulf %209, %213 : vector<32x32xf32>
      %215 = vector.broadcast %195 : vector<1x32xf32> to vector<32x32xf32>
      %216 = arith.mulf %214, %215 : vector<32x32xf32>
      %217 = vector.broadcast %196 : vector<1x32xf32> to vector<32x32xf32>
      %218 = arith.addf %216, %217 : vector<32x32xf32>
      %c0_77 = arith.constant 0 : index
      %c0_78 = arith.constant 0 : index
      %219 = vector.load %arg13[%c0_77, %c0_78] : memref<32x32xf32, #tpu.memory_space<vmem>>, vector<32x32xf32>
      tpu.vector_store %arg13[%c0_77, %c0_78], %218 {strides = array<i32>} : memref<32x32xf32, #tpu.memory_space<vmem>>, vector<32x32xf32>,
    } else {
    }
    %c0_2 = arith.constant 0 : index
    %c0_3 = arith.constant 0 : index
    %4 = vector.load %arg13[%c0_2, %c0_3] : memref<32x32xf32, #tpu.memory_space<vmem>>, vector<32x32xf32>
    %c0_4 = arith.constant 0 : index
    %c0_5 = arith.constant 0 : index
    %c0_6 = arith.constant 0 : index
    %5 = vector.load %arg2[%c0_4, %c0_5, %c0_6] : memref<2x1x16xf32, #tpu.memory_space<vmem>>, vector<2x1x16xf32>
    %c0_7 = arith.constant 0 : index
    %c0_8 = arith.constant 0 : index
    %c0_9 = arith.constant 0 : index
    %6 = vector.load %arg10[%c0_7, %c0_8, %c0_9] : memref<1x6x32xf32, #tpu.memory_space<vmem>>, vector<1x6x32xf32>
    %7 = vector.shape_cast %6 : vector<1x6x32xf32> to vector<6x32xf32>
    %c0_10 = arith.constant 0 : index
    %c0_11 = arith.constant 0 : index
    %c0_12 = arith.constant 0 : index
    %8 = vector.load %arg4[%c0_10, %c0_11, %c0_12] : memref<1x32x96xf32, #tpu.memory_space<vmem>>, vector<1x32x96xf32>
    %9 = vector.shape_cast %8 : vector<1x32x96xf32> to vector<32x96xf32>
    %cst = arith.constant dense<0.000000e+00> : vector<32x96xf32>
    %10 = tpu.matmul %4, %9, %cst {dimension_numbers = #tpu.dot_dimension_numbers<[1], [0], [0], [1], [0, 0, 1, 1], [], []>} : vector<32x32xf32>, vector<32x96xf32>, vector<32x96xf32> -> vector<32x96xf32>
    %c0_13 = arith.constant 0 : index
    %c0_14 = arith.constant 0 : index
    %c0_15 = arith.constant 0 : index
    %11 = vector.load %arg5[%c0_13, %c0_14, %c0_15] : memref<1x1x96xf32, #tpu.memory_space<vmem>>, vector<1x1x96xf32>
    %12 = vector.shape_cast %11 : vector<1x1x96xf32> to vector<1x96xf32>
    %13 = vector.broadcast %12 : vector<1x96xf32> to vector<32x96xf32>
    %14 = arith.addf %10, %13 : vector<32x96xf32>
    %15 = vector.shape_cast %14 : vector<32x96xf32> to vector<2x16x96xf32>
    %cst_16 = arith.constant 0.000000e+00 : f32
    %16 = vector.broadcast %cst_16 : f32 to vector<2x16xf32>
    %17 = vector.extract_strided_slice %15 {offsets = [0, 0, 0], sizes = [2, 16, 8], strides = [1, 1, 1]} : vector<2x16x96xf32> to vector<2x16x8xf32>
    %18 = vector.extract_strided_slice %15 {offsets = [0, 0, 32], sizes = [2, 16, 8], strides = [1, 1, 1]} : vector<2x16x96xf32> to vector<2x16x8xf32>
    %19 = vector.extract_strided_slice %15 {offsets = [0, 0, 64], sizes = [2, 16, 8], strides = [1, 1, 1]} : vector<2x16x96xf32> to vector<2x16x8xf32>
    "tpu.trace_start"() <{level = 10 : i32, message = "bqd,bkd->bqk"}> : () -> ()
    %cst_17 = arith.constant dense<0.000000e+00> : vector<2x16x16xf32>
    %20 = tpu.matmul %17, %18, %cst_17 {dimension_numbers = #tpu.dot_dimension_numbers<[2], [2], [1], [1], [0, 0, 0, 1, 1, 1], [0], [0]>} : vector<2x16x8xf32>, vector<2x16x8xf32>, vector<2x16x16xf32> -> vector<2x16x16xf32>
    "tpu.trace_stop"() : () -> ()
    %cst_18 = arith.constant 0.353553385 : f32
    %21 = vector.broadcast %cst_18 : f32 to vector<2x16x16xf32>
    %22 = arith.mulf %20, %21 : vector<2x16x16xf32>
    %23 = vector.broadcast %5 : vector<2x1x16xf32> to vector<2x16x16xf32>
    %24 = arith.addf %22, %23 : vector<2x16x16xf32>
    %cst_19 = arith.constant dense<0xFF800000> : vector<2x16xf32>
    %25 = vector.multi_reduction <maximumf>, %24, %cst_19 [2] : vector<2x16x16xf32> to vector<2x16xf32>
    %26 = vector.shape_cast %25 : vector<2x16xf32> to vector<2x16x1xf32>
    %27 = vector.broadcast %26 : vector<2x16x1xf32> to vector<2x16x16xf32>
    %28 = arith.subf %24, %27 : vector<2x16x16xf32>
    %29 = math.exp %28 : vector<2x16x16xf32>
    %cst_20 = arith.constant dense<0.000000e+00> : vector<2x16xf32>
    %30 = vector.multi_reduction <add>, %29, %cst_20 [2] : vector<2x16x16xf32> to vector<2x16xf32>
    %31 = vector.shape_cast %30 : vector<2x16xf32> to vector<2x16x1xf32>
    %32 = tpu.reciprocal %31 {approx = true} : vector<2x16x1xf32> -> vector<2x16x1xf32>
    %33 = vector.broadcast %32 : vector<2x16x1xf32> to vector<2x16x16xf32>
    %34 = arith.mulf %29, %33 : vector<2x16x16xf32>
    %35 = vector.extract_strided_slice %34 {offsets = [0, 0, 0], sizes = [2, 1, 16], strides = [1, 1, 1]} : vector<2x16x16xf32> to vector<2x1x16xf32>
    %36 = vector.shape_cast %35 : vector<2x1x16xf32> to vector<2x16xf32>
    %37 = arith.addf %16, %36 : vector<2x16xf32>
    "tpu.trace_start"() <{level = 10 : i32, message = "bqk,bkd->bqd"}> : () -> ()
    %cst_21 = arith.constant dense<0.000000e+00> : vector<2x16x8xf32>
    %38 = tpu.matmul %34, %19, %cst_21 {dimension_numbers = #tpu.dot_dimension_numbers<[2], [1], [1], [2], [0, 0, 0, 1, 1, 2], [0], [0]>} : vector<2x16x16xf32>, vector<2x16x8xf32>, vector<2x16x8xf32> -> vector<2x16x8xf32>
    "tpu.trace_stop"() : () -> ()
    %39 = vector.extract_strided_slice %15 {offsets = [0, 0, 8], sizes = [2, 16, 8], strides = [1, 1, 1]} : vector<2x16x96xf32> to vector<2x16x8xf32>
    %40 = vector.extract_strided_slice %15 {offsets = [0, 0, 40], sizes = [2, 16, 8], strides = [1, 1, 1]} : vector<2x16x96xf32> to vector<2x16x8xf32>
    %41 = vector.extract_strided_slice %15 {offsets = [0, 0, 72], sizes = [2, 16, 8], strides = [1, 1, 1]} : vector<2x16x96xf32> to vector<2x16x8xf32>
    "tpu.trace_start"() <{level = 10 : i32, message = "bqd,bkd->bqk"}> : () -> ()
    %cst_22 = arith.constant dense<0.000000e+00> : vector<2x16x16xf32>
    %42 = tpu.matmul %39, %40, %cst_22 {dimension_numbers = #tpu.dot_dimension_numbers<[2], [2], [1], [1], [0, 0, 0, 1, 1, 1], [0], [0]>} : vector<2x16x8xf32>, vector<2x16x8xf32>, vector<2x16x16xf32> -> vector<2x16x16xf32>
    "tpu.trace_stop"() : () -> ()
    %cst_23 = arith.constant 0.353553385 : f32
    %43 = vector.broadcast %cst_23 : f32 to vector<2x16x16xf32>
    %44 = arith.mulf %42, %43 : vector<2x16x16xf32>
    %45 = vector.broadcast %5 : vector<2x1x16xf32> to vector<2x16x16xf32>
    %46 = arith.addf %44, %45 : vector<2x16x16xf32>
    %cst_24 = arith.constant dense<0xFF800000> : vector<2x16xf32>
    %47 = vector.multi_reduction <maximumf>, %46, %cst_24 [2] : vector<2x16x16xf32> to vector<2x16xf32>
    %48 = vector.shape_cast %47 : vector<2x16xf32> to vector<2x16x1xf32>
    %49 = vector.broadcast %48 : vector<2x16x1xf32> to vector<2x16x16xf32>
    %50 = arith.subf %46, %49 : vector<2x16x16xf32>
    %51 = math.exp %50 : vector<2x16x16xf32>
    %cst_25 = arith.constant dense<0.000000e+00> : vector<2x16xf32>
    %52 = vector.multi_reduction <add>, %51, %cst_25 [2] : vector<2x16x16xf32> to vector<2x16xf32>
    %53 = vector.shape_cast %52 : vector<2x16xf32> to vector<2x16x1xf32>
    %54 = tpu.reciprocal %53 {approx = true} : vector<2x16x1xf32> -> vector<2x16x1xf32>
    %55 = vector.broadcast %54 : vector<2x16x1xf32> to vector<2x16x16xf32>
    %56 = arith.mulf %51, %55 : vector<2x16x16xf32>
    %57 = vector.extract_strided_slice %56 {offsets = [0, 0, 0], sizes = [2, 1, 16], strides = [1, 1, 1]} : vector<2x16x16xf32> to vector<2x1x16xf32>
    %58 = vector.shape_cast %57 : vector<2x1x16xf32> to vector<2x16xf32>
    %59 = arith.addf %37, %58 : vector<2x16xf32>
    "tpu.trace_start"() <{level = 10 : i32, message = "bqk,bkd->bqd"}> : () -> ()
    %cst_26 = arith.constant dense<0.000000e+00> : vector<2x16x8xf32>
    %60 = tpu.matmul %56, %41, %cst_26 {dimension_numbers = #tpu.dot_dimension_numbers<[2], [1], [1], [2], [0, 0, 0, 1, 1, 2], [0], [0]>} : vector<2x16x16xf32>, vector<2x16x8xf32>, vector<2x16x8xf32> -> vector<2x16x8xf32>
    "tpu.trace_stop"() : () -> ()
    %61 = vector.extract_strided_slice %15 {offsets = [0, 0, 16], sizes = [2, 16, 8], strides = [1, 1, 1]} : vector<2x16x96xf32> to vector<2x16x8xf32>
    %62 = vector.extract_strided_slice %15 {offsets = [0, 0, 48], sizes = [2, 16, 8], strides = [1, 1, 1]} : vector<2x16x96xf32> to vector<2x16x8xf32>
    %63 = vector.extract_strided_slice %15 {offsets = [0, 0, 80], sizes = [2, 16, 8], strides = [1, 1, 1]} : vector<2x16x96xf32> to vector<2x16x8xf32>
    "tpu.trace_start"() <{level = 10 : i32, message = "bqd,bkd->bqk"}> : () -> ()
    %cst_27 = arith.constant dense<0.000000e+00> : vector<2x16x16xf32>
    %64 = tpu.matmul %61, %62, %cst_27 {dimension_numbers = #tpu.dot_dimension_numbers<[2], [2], [1], [1], [0, 0, 0, 1, 1, 1], [0], [0]>} : vector<2x16x8xf32>, vector<2x16x8xf32>, vector<2x16x16xf32> -> vector<2x16x16xf32>
    "tpu.trace_stop"() : () -> ()
    %cst_28 = arith.constant 0.353553385 : f32
    %65 = vector.broadcast %cst_28 : f32 to vector<2x16x16xf32>
    %66 = arith.mulf %64, %65 : vector<2x16x16xf32>
    %67 = vector.broadcast %5 : vector<2x1x16xf32> to vector<2x16x16xf32>
    %68 = arith.addf %66, %67 : vector<2x16x16xf32>
    %cst_29 = arith.constant dense<0xFF800000> : vector<2x16xf32>
    %69 = vector.multi_reduction <maximumf>, %68, %cst_29 [2] : vector<2x16x16xf32> to vector<2x16xf32>
    %70 = vector.shape_cast %69 : vector<2x16xf32> to vector<2x16x1xf32>
    %71 = vector.broadcast %70 : vector<2x16x1xf32> to vector<2x16x16xf32>
    %72 = arith.subf %68, %71 : vector<2x16x16xf32>
    %73 = math.exp %72 : vector<2x16x16xf32>
    %cst_30 = arith.constant dense<0.000000e+00> : vector<2x16xf32>
    %74 = vector.multi_reduction <add>, %73, %cst_30 [2] : vector<2x16x16xf32> to vector<2x16xf32>
    %75 = vector.shape_cast %74 : vector<2x16xf32> to vector<2x16x1xf32>
    %76 = tpu.reciprocal %75 {approx = true} : vector<2x16x1xf32> -> vector<2x16x1xf32>
    %77 = vector.broadcast %76 : vector<2x16x1xf32> to vector<2x16x16xf32>
    %78 = arith.mulf %73, %77 : vector<2x16x16xf32>
    %79 = vector.extract_strided_slice %78 {offsets = [0, 0, 0], sizes = [2, 1, 16], strides = [1, 1, 1]} : vector<2x16x16xf32> to vector<2x1x16xf32>
    %80 = vector.shape_cast %79 : vector<2x1x16xf32> to vector<2x16xf32>
    %81 = arith.addf %59, %80 : vector<2x16xf32>
    "tpu.trace_start"() <{level = 10 : i32, message = "bqk,bkd->bqd"}> : () -> ()
    %cst_31 = arith.constant dense<0.000000e+00> : vector<2x16x8xf32>
    %82 = tpu.matmul %78, %63, %cst_31 {dimension_numbers = #tpu.dot_dimension_numbers<[2], [1], [1], [2], [0, 0, 0, 1, 1, 2], [0], [0]>} : vector<2x16x16xf32>, vector<2x16x8xf32>, vector<2x16x8xf32> -> vector<2x16x8xf32>
    "tpu.trace_stop"() : () -> ()
    %83 = vector.extract_strided_slice %15 {offsets = [0, 0, 24], sizes = [2, 16, 8], strides = [1, 1, 1]} : vector<2x16x96xf32> to vector<2x16x8xf32>
    %84 = vector.extract_strided_slice %15 {offsets = [0, 0, 56], sizes = [2, 16, 8], strides = [1, 1, 1]} : vector<2x16x96xf32> to vector<2x16x8xf32>
    %85 = vector.extract_strided_slice %15 {offsets = [0, 0, 88], sizes = [2, 16, 8], strides = [1, 1, 1]} : vector<2x16x96xf32> to vector<2x16x8xf32>
    "tpu.trace_start"() <{level = 10 : i32, message = "bqd,bkd->bqk"}> : () -> ()
    %cst_32 = arith.constant dense<0.000000e+00> : vector<2x16x16xf32>
    %86 = tpu.matmul %83, %84, %cst_32 {dimension_numbers = #tpu.dot_dimension_numbers<[2], [2], [1], [1], [0, 0, 0, 1, 1, 1], [0], [0]>} : vector<2x16x8xf32>, vector<2x16x8xf32>, vector<2x16x16xf32> -> vector<2x16x16xf32>
    "tpu.trace_stop"() : () -> ()
    %cst_33 = arith.constant 0.353553385 : f32
    %87 = vector.broadcast %cst_33 : f32 to vector<2x16x16xf32>
    %88 = arith.mulf %86, %87 : vector<2x16x16xf32>
    %89 = vector.broadcast %5 : vector<2x1x16xf32> to vector<2x16x16xf32>
    %90 = arith.addf %88, %89 : vector<2x16x16xf32>
    %cst_34 = arith.constant dense<0xFF800000> : vector<2x16xf32>
    %91 = vector.multi_reduction <maximumf>, %90, %cst_34 [2] : vector<2x16x16xf32> to vector<2x16xf32>
    %92 = vector.shape_cast %91 : vector<2x16xf32> to vector<2x16x1xf32>
    %93 = vector.broadcast %92 : vector<2x16x1xf32> to vector<2x16x16xf32>
    %94 = arith.subf %90, %93 : vector<2x16x16xf32>
    %95 = math.exp %94 : vector<2x16x16xf32>
    %cst_35 = arith.constant dense<0.000000e+00> : vector<2x16xf32>
    %96 = vector.multi_reduction <add>, %95, %cst_35 [2] : vector<2x16x16xf32> to vector<2x16xf32>
    %97 = vector.shape_cast %96 : vector<2x16xf32> to vector<2x16x1xf32>
    %98 = tpu.reciprocal %97 {approx = true} : vector<2x16x1xf32> -> vector<2x16x1xf32>
    %99 = vector.broadcast %98 : vector<2x16x1xf32> to vector<2x16x16xf32>
    %100 = arith.mulf %95, %99 : vector<2x16x16xf32>
    %101 = vector.extract_strided_slice %100 {offsets = [0, 0, 0], sizes = [2, 1, 16], strides = [1, 1, 1]} : vector<2x16x16xf32> to vector<2x1x16xf32>
    %102 = vector.shape_cast %101 : vector<2x1x16xf32> to vector<2x16xf32>
    %103 = arith.addf %81, %102 : vector<2x16xf32>
    "tpu.trace_start"() <{level = 10 : i32, message = "bqk,bkd->bqd"}> : () -> ()
    %cst_36 = arith.constant dense<0.000000e+00> : vector<2x16x8xf32>
    %104 = tpu.matmul %100, %85, %cst_36 {dimension_numbers = #tpu.dot_dimension_numbers<[2], [1], [1], [2], [0, 0, 0, 1, 1, 2], [0], [0]>} : vector<2x16x16xf32>, vector<2x16x8xf32>, vector<2x16x8xf32> -> vector<2x16x8xf32>
    "tpu.trace_stop"() : () -> ()
    %105 = tpu.concatenate %38, %60, %82, %104 in 2 : vector<2x16x8xf32>, vector<2x16x8xf32>, vector<2x16x8xf32>, vector<2x16x8xf32> -> vector<2x16x32xf32>
    %106 = vector.shape_cast %105 : vector<2x16x32xf32> to vector<32x32xf32>
    %c0_37 = arith.constant 0 : index
    %c0_38 = arith.constant 0 : index
    %c0_39 = arith.constant 0 : index
    %107 = vector.load %arg6[%c0_37, %c0_38, %c0_39] : memref<1x32x32xf32, #tpu.memory_space<vmem>>, vector<1x32x32xf32>
    %108 = vector.shape_cast %107 : vector<1x32x32xf32> to vector<32x32xf32>
    %cst_40 = arith.constant dense<0.000000e+00> : vector<32x32xf32>
    %109 = tpu.matmul %106, %108, %cst_40 {dimension_numbers = #tpu.dot_dimension_numbers<[1], [0], [0], [1], [0, 0, 1, 1], [], []>} : vector<32x32xf32>, vector<32x32xf32>, vector<32x32xf32> -> vector<32x32xf32>
    %110 = vector.extract_strided_slice %7 {offsets = [0, 0], sizes = [1, 32], strides = [1, 1]} : vector<6x32xf32> to vector<1x32xf32>
    %111 = vector.broadcast %110 : vector<1x32xf32> to vector<32x32xf32>
    %112 = arith.addf %109, %111 : vector<32x32xf32>
    %113 = arith.addf %4, %112 : vector<32x32xf32>
    %114 = vector.extract_strided_slice %7 {offsets = [1, 0], sizes = [1, 32], strides = [1, 1]} : vector<6x32xf32> to vector<1x32xf32>
    %115 = vector.extract_strided_slice %7 {offsets = [2, 0], sizes = [1, 32], strides = [1, 1]} : vector<6x32xf32> to vector<1x32xf32>
    %cst_41 = arith.constant dense<0.000000e+00> : vector<32xf32>
    %116 = vector.multi_reduction <add>, %113, %cst_41 [1] : vector<32x32xf32> to vector<32xf32>
    %117 = vector.shape_cast %116 : vector<32xf32> to vector<32x1xf32>
    %cst_42 = arith.constant 3.200000e+01 : f32
    %118 = vector.broadcast %cst_42 : f32 to vector<32x1xf32>
    %119 = arith.divf %117, %118 : vector<32x1xf32>
    %120 = vector.broadcast %119 : vector<32x1xf32> to vector<32x32xf32>
    %121 = arith.subf %113, %120 : vector<32x32xf32>
    %122 = arith.mulf %121, %121 : vector<32x32xf32>
    %cst_43 = arith.constant dense<0.000000e+00> : vector<32xf32>
    %123 = vector.multi_reduction <add>, %122, %cst_43 [1] : vector<32x32xf32> to vector<32xf32>
    %124 = vector.shape_cast %123 : vector<32xf32> to vector<32x1xf32>
    %cst_44 = arith.constant 3.200000e+01 : f32
    %125 = vector.broadcast %cst_44 : f32 to vector<32x1xf32>
    %126 = arith.divf %124, %125 : vector<32x1xf32>
    %127 = vector.broadcast %119 : vector<32x1xf32> to vector<32x32xf32>
    %128 = arith.subf %113, %127 : vector<32x32xf32>
    %cst_45 = arith.constant 9.99999996E-13 : f32
    %129 = vector.broadcast %cst_45 : f32 to vector<32x1xf32>
    %130 = arith.addf %126, %129 : vector<32x1xf32>
    %131 = math.rsqrt %130 : vector<32x1xf32>
    %132 = vector.broadcast %131 : vector<32x1xf32> to vector<32x32xf32>
    %133 = arith.mulf %128, %132 : vector<32x32xf32>
    %134 = vector.broadcast %114 : vector<1x32xf32> to vector<32x32xf32>
    %135 = arith.mulf %133, %134 : vector<32x32xf32>
    %136 = vector.broadcast %115 : vector<1x32xf32> to vector<32x32xf32>
    %137 = arith.addf %135, %136 : vector<32x32xf32>
    %c0_46 = arith.constant 0 : index
    %c0_47 = arith.constant 0 : index
    %c0_48 = arith.constant 0 : index
    %138 = vector.load %arg7[%c0_46, %c0_47, %c0_48] : memref<1x32x64xf32, #tpu.memory_space<vmem>>, vector<1x32x64xf32>
    %139 = vector.shape_cast %138 : vector<1x32x64xf32> to vector<32x64xf32>
    %cst_49 = arith.constant dense<0.000000e+00> : vector<32x64xf32>
    %140 = tpu.matmul %137, %139, %cst_49 {dimension_numbers = #tpu.dot_dimension_numbers<[1], [0], [0], [1], [0, 0, 1, 1], [], []>} : vector<32x32xf32>, vector<32x64xf32>, vector<32x64xf32> -> vector<32x64xf32>
    %c0_50 = arith.constant 0 : index
    %c0_51 = arith.constant 0 : index
    %c0_52 = arith.constant 0 : index
    %141 = vector.load %arg8[%c0_50, %c0_51, %c0_52] : memref<1x1x64xf32, #tpu.memory_space<vmem>>, vector<1x1x64xf32>
    %142 = vector.shape_cast %141 : vector<1x1x64xf32> to vector<1x64xf32>
    %143 = vector.broadcast %142 : vector<1x64xf32> to vector<32x64xf32>
    %144 = arith.addf %140, %143 : vector<32x64xf32>
    %cst_53 = arith.constant 5.000000e-01 : f32
    %145 = vector.broadcast %cst_53 : f32 to vector<32x64xf32>
    %146 = arith.mulf %145, %144 : vector<32x64xf32>
    %cst_54 = arith.constant 4.471500e-02 : f32
    %147 = vector.broadcast %cst_54 : f32 to vector<32x64xf32>
    %148 = arith.mulf %147, %144 : vector<32x64xf32>
    %149 = arith.mulf %148, %144 : vector<32x64xf32>
    %150 = arith.mulf %149, %144 : vector<32x64xf32>
    %151 = arith.addf %144, %150 : vector<32x64xf32>
    %cst_55 = arith.constant 0.797884583 : f32
    %152 = vector.broadcast %cst_55 : f32 to vector<32x64xf32>
    %153 = arith.mulf %152, %151 : vector<32x64xf32>
    %154 = math.tanh %153 : vector<32x64xf32>
    %cst_56 = arith.constant 1.000000e+00 : f32
    %155 = vector.broadcast %cst_56 : f32 to vector<32x64xf32>
    %156 = arith.addf %155, %154 : vector<32x64xf32>
    %157 = arith.mulf %146, %156 : vector<32x64xf32>
    %c0_57 = arith.constant 0 : index
    %c0_58 = arith.constant 0 : index
    %c0_59 = arith.constant 0 : index
    %158 = vector.load %arg9[%c0_57, %c0_58, %c0_59] : memref<1x64x32xf32, #tpu.memory_space<vmem>>, vector<1x64x32xf32>
    %159 = vector.shape_cast %158 : vector<1x64x32xf32> to vector<64x32xf32>
    %cst_60 = arith.constant dense<0.000000e+00> : vector<32x32xf32>
    %160 = tpu.matmul %157, %159, %cst_60 {dimension_numbers = #tpu.dot_dimension_numbers<[1], [0], [0], [1], [0, 0, 1, 1], [], []>} : vector<32x64xf32>, vector<64x32xf32>, vector<32x32xf32> -> vector<32x32xf32>
    %161 = vector.extract_strided_slice %7 {offsets = [3, 0], sizes = [1, 32], strides = [1, 1]} : vector<6x32xf32> to vector<1x32xf32>
    %162 = vector.broadcast %161 : vector<1x32xf32> to vector<32x32xf32>
    %163 = arith.addf %160, %162 : vector<32x32xf32>
    %164 = arith.addf %137, %163 : vector<32x32xf32>
    %165 = vector.extract_strided_slice %7 {offsets = [4, 0], sizes = [1, 32], strides = [1, 1]} : vector<6x32xf32> to vector<1x32xf32>
    %166 = vector.extract_strided_slice %7 {offsets = [5, 0], sizes = [1, 32], strides = [1, 1]} : vector<6x32xf32> to vector<1x32xf32>
    %cst_61 = arith.constant dense<0.000000e+00> : vector<32xf32>
    %167 = vector.multi_reduction <add>, %164, %cst_61 [1] : vector<32x32xf32> to vector<32xf32>
    %168 = vector.shape_cast %167 : vector<32xf32> to vector<32x1xf32>
    %cst_62 = arith.constant 3.200000e+01 : f32
    %169 = vector.broadcast %cst_62 : f32 to vector<32x1xf32>
    %170 = arith.divf %168, %169 : vector<32x1xf32>
    %171 = vector.broadcast %170 : vector<32x1xf32> to vector<32x32xf32>
    %172 = arith.subf %164, %171 : vector<32x32xf32>
    %173 = arith.mulf %172, %172 : vector<32x32xf32>
    %cst_63 = arith.constant dense<0.000000e+00> : vector<32xf32>
    %174 = vector.multi_reduction <add>, %173, %cst_63 [1] : vector<32x32xf32> to vector<32xf32>
    %175 = vector.shape_cast %174 : vector<32xf32> to vector<32x1xf32>
    %cst_64 = arith.constant 3.200000e+01 : f32
    %176 = vector.broadcast %cst_64 : f32 to vector<32x1xf32>
    %177 = arith.divf %175, %176 : vector<32x1xf32>
    %178 = vector.broadcast %170 : vector<32x1xf32> to vector<32x32xf32>
    %179 = arith.subf %164, %178 : vector<32x32xf32>
    %cst_65 = arith.constant 9.99999996E-13 : f32
    %180 = vector.broadcast %cst_65 : f32 to vector<32x1xf32>
    %181 = arith.addf %177, %180 : vector<32x1xf32>
    %182 = math.rsqrt %181 : vector<32x1xf32>
    %183 = vector.broadcast %182 : vector<32x1xf32> to vector<32x32xf32>
    %184 = arith.mulf %179, %183 : vector<32x32xf32>
    %185 = vector.broadcast %165 : vector<1x32xf32> to vector<32x32xf32>
    %186 = arith.mulf %184, %185 : vector<32x32xf32>
    %187 = vector.broadcast %166 : vector<1x32xf32> to vector<32x32xf32>
    %188 = arith.addf %186, %187 : vector<32x32xf32>
    %c0_66 = arith.constant 0 : index
    %c0_67 = arith.constant 0 : index
    %189 = vector.load %arg13[%c0_66, %c0_67] : memref<32x32xf32, #tpu.memory_space<vmem>>, vector<32x32xf32>
    tpu.vector_store %arg13[%c0_66, %c0_67], %188 {strides = array<i32>} : memref<32x32xf32, #tpu.memory_space<vmem>>, vector<32x32xf32>,
    %c1_i32 = arith.constant 1 : i32
    %190 = arith.cmpi eq, %arg0, %c1_i32 : i32
    %191 = arith.extui %190 : i1 to i32
    %c0_i32_68 = arith.constant 0 : i32
    %192 = arith.cmpi ne, %191, %c0_i32_68 : i32
    scf.if %192 {
      %193 = vector.shape_cast %188 : vector<32x32xf32> to vector<2x16x32xf32>
      %c0_69 = arith.constant 0 : index
      %c0_70 = arith.constant 0 : index
      %c0_71 = arith.constant 0 : index
      %194 = vector.load %arg11[%c0_69, %c0_70, %c0_71] : memref<2x16x32xf32, #tpu.memory_space<vmem>>, vector<2x16x32xf32>
      tpu.vector_store %arg11[%c0_69, %c0_70, %c0_71], %193 {strides = array<i32>} : memref<2x16x32xf32, #tpu.memory_space<vmem>>, vector<2x16x32xf32>,
      %cst_72 = arith.constant 2.500000e-01 : f32
      %195 = vector.broadcast %cst_72 : f32 to vector<2x16xf32>
      %196 = arith.mulf %103, %195 : vector<2x16xf32>
      %c0_73 = arith.constant 0 : index
      %c0_74 = arith.constant 0 : index
      %197 = vector.load %arg12[%c0_73, %c0_74] : memref<2x16xf32, #tpu.memory_space<vmem>>, vector<2x16xf32>
      tpu.vector_store %arg12[%c0_73, %c0_74], %196 {strides = array<i32>} : memref<2x16xf32, #tpu.memory_space<vmem>>, vector<2x16xf32>,
    } else {
    }
    return
  }
  func.func @transform_0(%arg0: i32) -> (i32, i32, i32) {
    %c0_i32 = arith.constant 0 : i32
    %c0_i32_0 = arith.constant 0 : i32
    %c0_i32_1 = arith.constant 0 : i32
    %c0_i32_2 = arith.constant 0 : i32
    return %c0_i32, %c0_i32_0, %c0_i32_1 : i32, i32, i32
  }
  func.func @transform_1(%arg0: i32) -> (i32, i32, i32) {
    %c0_i32 = arith.constant 0 : i32
    %c0_i32_0 = arith.constant 0 : i32
    %c0_i32_1 = arith.constant 0 : i32
    %c0_i32_2 = arith.constant 0 : i32
    return %c0_i32, %c0_i32_0, %c0_i32_1 : i32, i32, i32
  }
  func.func @transform_2(%arg0: i32) -> (i32, i32) {
    %c0_i32 = arith.constant 0 : i32
    %c0_i32_0 = arith.constant 0 : i32
    %c0_i32_1 = arith.constant 0 : i32
    return %c0_i32, %c0_i32_0 : i32, i32
  }
  func.func @transform_3(%arg0: i32) -> (i32, i32, i32) {
    %c0_i32 = arith.constant 0 : i32
    %c0_i32_0 = arith.constant 0 : i32
    %c0_i32_1 = arith.constant 0 : i32
    return %arg0, %c0_i32, %c0_i32_0 : i32, i32, i32
  }
  func.func @transform_4(%arg0: i32) -> (i32, i32, i32) {
    %c0_i32 = arith.constant 0 : i32
    %c0_i32_0 = arith.constant 0 : i32
    %c0_i32_1 = arith.constant 0 : i32
    return %arg0, %c0_i32, %c0_i32_0 : i32, i32, i32
  }
  func.func @transform_5(%arg0: i32) -> (i32, i32, i32) {
    %c0_i32 = arith.constant 0 : i32
    %c0_i32_0 = arith.constant 0 : i32
    %c0_i32_1 = arith.constant 0 : i32
    return %arg0, %c0_i32, %c0_i32_0 : i32, i32, i32
  }
  func.func @transform_6(%arg0: i32) -> (i32, i32, i32) {
    %c0_i32 = arith.constant 0 : i32
    %c0_i32_0 = arith.constant 0 : i32
    %c0_i32_1 = arith.constant 0 : i32
    return %arg0, %c0_i32, %c0_i32_0 : i32, i32, i32
  }
  func.func @transform_7(%arg0: i32) -> (i32, i32, i32) {
    %c0_i32 = arith.constant 0 : i32
    %c0_i32_0 = arith.constant 0 : i32
    %c0_i32_1 = arith.constant 0 : i32
    return %arg0, %c0_i32, %c0_i32_0 : i32, i32, i32
  }
  func.func @transform_8(%arg0: i32) -> (i32, i32, i32) {
    %c0_i32 = arith.constant 0 : i32
    %c0_i32_0 = arith.constant 0 : i32
    %c0_i32_1 = arith.constant 0 : i32
    return %arg0, %c0_i32, %c0_i32_0 : i32, i32, i32
  }
  func.func @transform_9(%arg0: i32) -> (i32, i32, i32) {
    %c0_i32 = arith.constant 0 : i32
    %c0_i32_0 = arith.constant 0 : i32
    %c0_i32_1 = arith.constant 0 : i32
    return %arg0, %c0_i32, %c0_i32_0 : i32, i32, i32
  }
  func.func @transform_10(%arg0: i32) -> (i32, i32, i32) {
    %c0_i32 = arith.constant 0 : i32
    %c0_i32_0 = arith.constant 0 : i32
    %c0_i32_1 = arith.constant 0 : i32
    %c0_i32_2 = arith.constant 0 : i32
    return %c0_i32, %c0_i32_0, %c0_i32_1 : i32, i32, i32
  }
  func.func @transform_11(%arg0: i32) -> (i32, i32) {
    %c0_i32 = arith.constant 0 : i32
    %c0_i32_0 = arith.constant 0 : i32
    %c0_i32_1 = arith.constant 0 : i32
    return %c0_i32, %c0_i32_0 : i32, i32
  }
}

</mosaic_0001>

<bundles_post_ra>
// kernel: text_encoder_forward.1
= control target key start
LH: loop header
LB: loop body
LE: loop exit
PB: predicated region body
PF: predicated region fallthrough
CT: control target
= control target key end

     0   :  { %s2380_s17 = smov 0   ;;  %s2931_s0 = inlined_call_operand.vmem [shape: f32[2,16,32], index: 0, kind: input, shape index: {}]   ;;  %s2932_s1 = inlined_call_operand.vmem [shape: f32[2,1,16], index: 1, kind: input, shape index: {}]   ;;  %s2933_s2 = inlined_call_operand.vmem [shape: f32[2,32], index: 2, kind: input, shape index: {}]   ;;  %s2934_s3 = inlined_call_operand.vmem [shape: f32[2,32,96], index: 3, kind: input, shape index: {}]   ;;  %s2935_s4 = inlined_call_operand.vmem [shape: f32[2,1,96], index: 4, kind: input, shape index: {}]   ;;  %s2936_s5 = inlined_call_operand.vmem [shape: f32[2,32,32], index: 5, kind: input, shape index: {}]   ;;  %s2937_s6 = inlined_call_operand.vmem [shape: f32[2,32,64], index: 6, kind: input, shape index: {}]   ;;  %s2938_s7 = inlined_call_operand.vmem [shape: f32[2,1,64], index: 7, kind: input, shape index: {}]   ;;  %s2939_s8 = inlined_call_operand.vmem [shape: f32[2,64,32], index: 8, kind: input, shape index: {}]   ;;  %s2940_s9 = inlined_call_operand.vmem [shape: f32[2,6,32], index: 9, kind: input, shape index: {}]   ;;  %s2941_s10 = inlined_call_operand.vmem [shape: f32[2,16,32], index: 10, kind: output, shape index: {0}]   ;;  %s2942_s11 = inlined_call_operand.vmem [shape: f32[2,16], index: 11, kind: output, shape index: {1}]  }
   0x1   :  { %2943 = sst [smem:[#allocation3_spill]] %s2933_s2 }
   0x2 LB: > { %s2386_s18 = sadd.s32 4294967295, %s2302_s17   ;;  %p2042_p0 = scmp.ge.s32.totalorder %s2302_s17, 1  ;;  %s2302_s17 = sphi %s2380_s17, %s22_s17  }
   0x3   : > { %p385_p1 = scmp.lt.s32.totalorder %s2302_s17, 3 }
   0x5   : > { %p386_p2 = pnand %p2042_p0, %p385_p1 }
   0x6   : > { %p445_p3 = scmp.lt.s32.totalorder (!%p386_p2), %s2386_s18, 1  ;;  %s2944_s2 = sld [smem:[#allocation3_spill]] (!%p386_p2) }
   0x7   : > { %389 = sbr.rel (%p386_p2) target bundleno = 2340 (0x924), region = 60  ;;  %p2052_p4 = scmp.ne.s32.totalorder (!%p386_p2), %s2386_s18, 0 }
   0xc   : > { %v2394_v0 = vld [vmem:[%s2944_s2] sm:$0x3]  ;;  %s2397_s21 = scalar_select %p445_p3, %s2386_s18, 1 }
   0xe   : > { %s2120_s22 = sshll.u32 %s2397_s21, 5  ;;  %s465_s20 = scalar_lea.vmem %s2938_s7, %s2397_s21 }
   0xf   : > { %s2407_s28 = scalar_lea.vmem %s2934_s3, %s2120_s22  ;;  %s2412_s12 = scalar_lea.vmem %s2936_s5, %s2120_s22 }
  0x10   : > { %s2417_s15 = scalar_lea.vmem %s2937_s6, %s2120_s22  ;;  %s2123_s23 = sshll.u32 %s2397_s21, 6 }
  0x11   : > { %s2051_s24 = sshll.u32 %s2397_s21, 3  ;;  %s2428_s27 = scalar_lea.vmem %s2939_s8, %s2123_s23 }
  0x12   : > { %s2433_s30 = scalar_lea.vmem %s2940_s9, %s2051_s24  ;;  %479 = sbr.rel (%p2052_p4) target bundleno = 302 (0x12e), region = 64 }
  0x17   : > { %v482_v1 = vld [vmem:[%s2931_s0 + $0x10] sm:$0xff]  ;;  %vm484_vm0 = vcmask 261120   ;;  %v480_v2 = vld [vmem:[%s2931_s0] sm:$0xff]  ;;  %v483_v5 = vld [vmem:[%s2931_s0 + $0x18] sm:$0xff]  ;;  %v2304_v9 = vmov 32.0   ;;  %v580_v62 = vperm.slane %v2394_v0, 0 }
  0x18   : > { %v491_v3 = vsel %vm484_vm0, %v482_v1, 0.0  ;;  %v485_v4 = vsel %vm484_vm0, %v480_v2, 0.0  ;;  %v481_v6 = vld [vmem:[%s2931_s0 + $0x8] sm:$0xff]  ;;  %v494_v7 = vsel %vm484_vm0, %v483_v5, 0.0  ;;  %2148 = vrcp.f32 %v2304_v9 }
  0x19   : > { %492 = vadd.xlane.f32.xlu1 %v491_v3  ;;  %486 = vadd.xlane.f32.xlu0 %v485_v4  ;;  %v488_v8 = vsel %vm484_vm0, %v481_v6, 0.0  ;;  %v585_v4 = vperm.slane %v2394_v0, 1 }
  0x1e   : > { %v2149_v10 = vpop.eup %2148 }
  0x1f   : > { %v498_v11 = vmul.f32 32.0, %v2149_v10  ;;  %vm502_vm1 = vweird.f32 %v2149_v10 }
  0x21   : > { %495 = vadd.xlane.f32.xlu1 %v494_v7  ;;  %489 = vadd.xlane.f32.xlu0 %v488_v8  ;;  %v499_v12 = vsub.f32 1.0, %v498_v11 }
  0x23   : > { %v500_v13 = vmul.f32 %v2149_v10, %v499_v12 }
  0x25   : > { %v501_v14 = vadd.f32 %v2149_v10, %v500_v13 }
  0x27   : > { %v503_v15 = vsel %vm502_vm1, %v2149_v10, %v501_v14 }
  0x8c   : > { %v493_v16 = vpop.xlane.xlu1 %492  ;;  %v487_v17 = vpop.xlane.xlu0 %486 }
  0x8d   : > { %v506_v18 = vmul.f32 %v503_v15, %v493_v16  ;;  %v504_v19 = vmul.f32 %v503_v15, %v487_v17 }
  0x8f   : > { %v2452_v20 = vsub.f32 %v482_v1, %v506_v18  ;;  %v508_v21 = vsub.f32 %v480_v2, %v504_v19 }
  0x91   : > { %v514_v22 = vmul.f32 %v2452_v20, %v2452_v20  ;;  %v512_v23 = vmul.f32 %v508_v21, %v508_v21 }
  0x93   : > { %v522_v24 = vsel %vm484_vm0, %v514_v22, 0.0  ;;  %v516_v25 = vsel %vm484_vm0, %v512_v23, 0.0 }
  0x94   : > { %v496_v26 = vpop.xlane.xlu1 %495  ;;  %523 = vadd.xlane.f32.xlu0 %v522_v24  ;;  %517 = vadd.xlane.f32.xlu2 %v516_v25  ;;  %v490_v27 = vpop.xlane.xlu0 %489 }
  0x95   : > { %v507_v28 = vmul.f32 %v503_v15, %v496_v26  ;;  %v505_v29 = vmul.f32 %v503_v15, %v490_v27 }
  0x97   : > { %v2458_v30 = vsub.f32 %v483_v5, %v507_v28  ;;  %v2460_v31 = vsub.f32 %v481_v6, %v505_v29 }
  0x99   : > { %v515_v32 = vmul.f32 %v2458_v30, %v2458_v30  ;;  %v513_v33 = vmul.f32 %v2460_v31, %v2460_v31 }
  0x9b   : > { %v525_v34 = vsel %vm484_vm0, %v515_v32, 0.0  ;;  %v519_v35 = vsel %vm484_vm0, %v513_v33, 0.0 }
  0x9c   : > { %526 = vadd.xlane.f32.xlu1 %v525_v34  ;;  %520 = vadd.xlane.f32.xlu2 %v519_v35 }
 0x107   : > { %v518_v36 = vpop.xlane.xlu2 %517  ;;  %v524_v37 = vpop.xlane.xlu0 %523 }
 0x108   : > { %v528_v38 = vmul.f32 %v518_v36, %v503_v15  ;;  %v530_v39 = vmul.f32 %v524_v37, %v503_v15 }
 0x10a   : > { %v532_v40 = vadd.f32 1e-12, %v528_v38  ;;  %v534_v41 = vadd.f32 1e-12, %v530_v39 }
 0x10c   : > { %2150 = vrsqrt.f32 %v532_v40  ;;  %vm542_vm4 = vweird.f32 %v532_v40  ;;  %vm562_vm6 = vweird.f32 %v534_v41 }
 0x10d   : > { %2152 = vrsqrt.f32 %v534_v41 }
 0x10f   : > { %v527_v42 = vpop.xlane.xlu1 %526  ;;  %v521_v43 = vpop.xlane.xlu2 %520 }
 0x110   : > { %v531_v44 = vmul.f32 %v527_v42, %v503_v15  ;;  %v529_v45 = vmul.f32 %v521_v43, %v503_v15 }
 0x112   : > { %v2151_v46 = vpop.eup %2150  ;;  %v535_v47 = vadd.f32 1e-12, %v531_v44  ;;  %v533_v48 = vadd.f32 1e-12, %v529_v45 }
 0x113   : > { %v2153_v49 = vpop.eup %2152  ;;  %v537_v50 = vmul.f32 %v2151_v46, %v532_v40  ;;  %vm543_vm2 = vweird.f32 %v2151_v46 }
 0x114   : > { %v557_v51 = vmul.f32 %v2153_v49, %v534_v41  ;;  %2154 = vrsqrt.f32 %v535_v47  ;;  %vm563_vm3 = vweird.f32 %v2153_v49  ;;  %vm544_vm5 = vmor %vm542_vm4, %vm543_vm2  ;;  %vm572_vm10 = vweird.f32 %v535_v47 }
 0x115   : > { %v538_v52 = vmul.f32 %v2151_v46, %v537_v50  ;;  %2156 = vrsqrt.f32 %v533_v48  ;;  %vm564_vm7 = vmor %vm562_vm6, %vm563_vm3  ;;  %vm552_vm12 = vweird.f32 %v533_v48 }
 0x116   : > { %v558_v53 = vmul.f32 %v2153_v49, %v557_v51 }
 0x117   : > { %v539_v54 = vmul.f32 0.5, %v538_v52 }
 0x118   : > { %v559_v55 = vmul.f32 0.5, %v558_v53 }
 0x119   : > { %v540_v56 = vsub.f32 1.5, %v539_v54 }
 0x11a   : > { %v2155_v57 = vpop.eup %2154  ;;  %v560_v58 = vsub.f32 1.5, %v559_v55 }
 0x11b   : > { %v2157_v59 = vpop.eup %2156  ;;  %v541_v60 = vmul.f32 %v2151_v46, %v540_v56  ;;  %v567_v61 = vmul.f32 %v2155_v57, %v535_v47  ;;  %vm573_vm8 = vweird.f32 %v2155_v57 }
 0x11c   : > { %v561_v63 = vmul.f32 %v2153_v49, %v560_v58  ;;  %v547_v1 = vmul.f32 %v2157_v59, %v533_v48  ;;  %vm553_vm9 = vweird.f32 %v2157_v59  ;;  %vm574_vm11 = vmor %vm572_vm10, %vm573_vm8 }
 0x11d   : > { %v545_v2 = vsel %vm544_vm5, %v2151_v46, %v541_v60  ;;  %v568_v3 = vmul.f32 %v2155_v57, %v567_v61  ;;  %vm554_vm13 = vmor %vm552_vm12, %vm553_vm9 }
 0x11e   : > { %v576_v5 = vmul.f32 %v545_v2, %v508_v21  ;;  %v565_v6 = vsel %vm564_vm7, %v2153_v49, %v561_v63  ;;  %v548_v7 = vmul.f32 %v2157_v59, %v547_v1 }
 0x11f   : > { %v578_v8 = vmul.f32 %v565_v6, %v2452_v20  ;;  %v569_v9 = vmul.f32 0.5, %v568_v3 }
 0x120   : > { %v581_v10 = vmul.f32 %v580_v62, %v576_v5  ;;  %v549_v11 = vmul.f32 0.5, %v548_v7 }
 0x121   : > { %v583_v12 = vmul.f32 %v580_v62, %v578_v8  ;;  %v570_v13 = vsub.f32 1.5, %v569_v9 }
 0x122   : > { %v586_v14 = vadd.f32 %v585_v4, %v581_v10  ;;  %v550_v15 = vsub.f32 1.5, %v549_v11 }
 0x123   : > { %v588_v16 = vadd.f32 %v585_v4, %v583_v12  ;;  %v571_v17 = vmul.f32 %v2155_v57, %v570_v13 }
 0x124   : > { %590 = vst.msk [vmem:[#allocation2] sm:$0xff] %vm484_vm0, %v586_v14  ;;  %v551_v0 = vmul.f32 %v2157_v59, %v550_v15 }
 0x125   : > { %592 = vst.msk [vmem:[#allocation2 + $0x10] sm:$0xff] %vm484_vm0, %v588_v16  ;;  %v575_v18 = vsel %vm574_vm11, %v2155_v57, %v571_v17 }
 0x126   : > { %v579_v19 = vmul.f32 %v575_v18, %v2458_v30  ;;  %v555_v20 = vsel %vm554_vm13, %v2157_v59, %v551_v0 }
 0x127   : > { %v577_v21 = vmul.f32 %v555_v20, %v2460_v31 }
 0x128   : > { %v584_v22 = vmul.f32 %v580_v62, %v579_v19 }
 0x129   : > { %v582_v23 = vmul.f32 %v580_v62, %v577_v21 }
 0x12a   : > { %v589_v24 = vadd.f32 %v585_v4, %v584_v22 }
 0x12b   : > { %v587_v25 = vadd.f32 %v585_v4, %v582_v23 }
 0x12c   : > { %593 = vst.msk [vmem:[#allocation2 + $0x18] sm:$0xff] %vm484_vm0, %v589_v24 }
 0x12d   : > { %591 = vst.msk [vmem:[#allocation2 + $0x8] sm:$0xff] %vm484_vm0, %v587_v25 }
 0x12e PF: > { %v604_v26 = vld [vmem:[%s2407_s28 + $0x18] sm:$0xff]  ;;  %v603_v27 = vld [vmem:[%s2407_s28 + $0x10] sm:$0xff]  ;;  %v602_v28 = vld [vmem:[%s2407_s28 + $0x8] sm:$0xff]  ;;  %vm609_vm14 = vcmask 261120   ;;  %s2305_s29 = smov 88   ;;  %s2306_s22 = smov 96  }
 0x12f   : > { %634 = vmatpush.msra.mxu0 %v604_v26  ;;  %v601_v29 = vld [vmem:[%s2407_s28] sm:$0xff]  ;;  %v596_v32 = vld [vmem:[#allocation2 + $0x10] sm:$0xff]  ;;  %s2945_s28 = scalar_lea.vmem %s2935_s4, %s2397_s21  ;;  %s2307_s13 = smov 80   ;;  %vm657_vm15 = vcmask 64512   ;;  %vm740_vm0 = vcmask 130048   ;;  %vm1519_vm1 = vcmask 195584  }
 0x130   : > { %v594_v30 = vld [vmem:[#allocation2] sm:$0xff]  ;;  %s2308_s14 = smov 120   ;;  %s2309_s16 = smov 72  }
 0x131   : > { %635 = vmatpush.msra.mxu0 %v603_v27  ;;  %v2198_v35 = vld [vmem:[%s2945_s28] ss:$0 sm:$0xff]  ;;  %s2310_s2 = smov 112   ;;  %s2311_s25 = smov 104  }
 0x132   : > { %s2312_s19 = smov 64   ;;  %s2313_s23 = smov 56   ;;  %v2555_v18 = vld [vmem:[%s2932_s1] ss:$0 sm:$0xff] }
 0x133   : > { %636 = vmatpush.msra.mxu0 %v602_v28  ;;  %v597_v33 = vld [vmem:[#allocation2 + $0x18] sm:$0xff]  ;;  %v2570_v28 = vld [vmem:[%s2932_s1 + $0x1] ss:$0 sm:$0xff]  ;;  %p2117_p5 = scmp.ne.s32.totalorder %s2386_s18, 1 }
 0x134   : > { %v595_v31 = vld [vmem:[#allocation2 + $0x8] sm:$0xff] }
 0x135   : > { %637 = vmatpush.msra.mxu0 %v601_v29 }
 0x136   : > { %2053 = vmatmul.msk.f32.vlgmr.msra.gmra.mxu0 %vm609_vm14, %v594_v30 }
 0x13e   : > { %2054 = vmatmul.msk.f32.gmra.mxu0 %vm609_vm14, %v595_v31 }
 0x146   : > { %2055 = vmatmul.msk.f32.gmra.mxu0 %vm609_vm14, %v596_v32 }
 0x14e   : > { %2056 = vmatmul.msk.f32.gmra.mxu0 %vm609_vm14, %v597_v33 }
 0x1b3   : > { %v639_v34 = vpop.f32.mrf.mxu0 }
 0x1b4   : > { %v640_v39 = vadd.f32 %v2198_v35, %v639_v34 }
 0x1bb   : > { %v642_v36 = vpop.f32.mrf.mxu0 }
 0x1bc   : > { %v2490_v37 = vadd.f32 %v2198_v35, %v642_v36 }
 0x1be   : > { %863 = vrot.lane.b32.xlu2 %v2490_v37, %s2305_s29  ;;  %655 = vrot.lane.b32.xlu1 %v2490_v37, %s2306_s22  ;;  %v2510_v44 = vpack.i.bf16 %v640_v39, %v2490_v37 }
 0x1c3   : > { %v645_v38 = vpop.f32.mrf.mxu0 }
 0x1c4   : > { %v646_v42 = vadd.f32 %v2198_v35, %v645_v38 }
 0x1c6   : > { %861 = vrot.lane.b32.xlu2 %v640_v39, %s2305_s29  ;;  %653 = vrot.lane.b32.xlu1 %v640_v39, %s2306_s22 }
 0x1cb   : > { %v648_v40 = vpop.f32.mrf.mxu0 }
 0x1cc   : > { %v2494_v41 = vadd.f32 %v2198_v35, %v648_v40 }
 0x1ce   : > { %693 = vrot.lane.b32.xlu0 %v2494_v41, %s2306_s22  ;;  %1063 = vrot.lane.b32.xlu2 %v640_v39, %s2307_s13  ;;  %v2507_v43 = vpack.i.bf16 %v646_v42, %v2494_v41 }
 0x1cf   : > { %859 = vrot.lane.b32.xlu1 %v2490_v37, %s2308_s14 }
 0x1d6   : > { %691 = vrot.lane.b32.xlu0 %v646_v42, %s2306_s22  ;;  %902 = vrot.lane.b32.xlu2 %v2494_v41, %s2305_s29  ;;  %s2314_s22 = smov 48  }
 0x1d7   : > { %900 = vrot.lane.b32.xlu1 %v646_v42, %s2305_s29 }
 0x1de   : > { %857 = vrot.lane.b32.xlu0 %v640_v39, %s2308_s14  ;;  %1267 = vrot.lane.b32.xlu2 %v2490_v37, %s2309_s16 }
 0x1df   : > { %1059 = vrot.lane.b32.xlu1 %v640_v39, %s2310_s2 }
 0x1e6   : > { %1065 = vrot.lane.b32.xlu0 %v2490_v37, %s2307_s13  ;;  %898 = vrot.lane.b32.xlu2 %v2494_v41, %s2308_s14 }
 0x1e7   : > { %1104 = vrot.lane.b32.xlu1 %v2494_v41, %s2307_s13 }
 0x1ee   : > { %896 = vrot.lane.b32.xlu0 %v646_v42, %s2308_s14  ;;  %1098 = vrot.lane.b32.xlu2 %v646_v42, %s2310_s2  ;;  %s2316_s14 = smov 8  }
 0x1ef   : > { %1265 = vrot.lane.b32.xlu1 %v640_v39, %s2309_s16 }
 0x1f6   : > { %1061 = vrot.lane.b32.xlu0 %v2490_v37, %s2310_s2  ;;  %1263 = vrot.lane.b32.xlu2 %v2490_v37, %s2311_s25 }
 0x1f7   : > { %1100 = vrot.lane.b32.xlu1 %v2494_v41, %s2310_s2  ;;  %s2318_s2 = smov 24  }
 0x1fe   : > { %1102 = vrot.lane.b32.xlu0 %v646_v42, %s2307_s13  ;;  %1300 = vrot.lane.b32.xlu2 %v646_v42, %s2311_s25  ;;  %s2315_s13 = smov 40  }
 0x1ff   : > { %1304 = vrot.lane.b32.xlu1 %v646_v42, %s2309_s16 }
 0x206   : > { %1261 = vrot.lane.b32.xlu0 %v640_v39, %s2311_s25  ;;  %2169 = vrot.lane.b32.xlu2 %v2507_v43, %s2312_s19 }
 0x207   : > { %2159 = vrot.lane.b32.xlu1 %v2510_v44, %s2313_s23 }
 0x20e   : > { %1306 = vrot.lane.b32.xlu0 %v2494_v41, %s2309_s16  ;;  %s2317_s16 = smov 16  }
 0x216   : > { %1302 = vrot.lane.b32.xlu0 %v2494_v41, %s2311_s25 }
 0x218   : > { %v864_v45 = vpop.permute.xlu2 %863 }
 0x21e   : > { %2164 = vrot.lane.b32.xlu0 %v2510_v44, %s2312_s19 }
 0x220   : > { %v862_v46 = vpop.permute.xlu2 %861 }
 0x228   : > { %v1064_v47 = vpop.permute.xlu2 %1063 }
 0x230   : > { %v656_v48 = vpop.permute.xlu1 %655  ;;  %v903_v49 = vpop.permute.xlu2 %902 }
 0x231   : > { %2057 = vmatpush.xpose.msk.msra.mxu1 %vm657_vm15, %v656_v48 }
 0x238   : > { %v1268_v50 = vpop.permute.xlu2 %1267  ;;  %v654_v51 = vpop.permute.xlu1 %653 }
 0x239   : > { %2058 = vmatpush.xpose.msk.msra.mxu1 %vm657_vm15, %v654_v51 }
 0x23c   : > { %2059 = vmatmul.msk.f32.vlgmr.msra.gmra.mxu1 %vm657_vm15, %v640_v39 }
 0x23d   : > { %2069 = vmatpush.xpose.msk.msrb.mxu1 %vm657_vm15, %v864_v45 }
 0x240   : > { %v694_v52 = vpop.permute.xlu0 %693  ;;  %v899_v53 = vpop.permute.xlu2 %898 }
 0x241   : > { %2070 = vmatpush.xpose.msk.msrb.mxu1 %vm657_vm15, %v862_v46  ;;  %v860_v54 = vpop.permute.xlu1 %859  ;;  %2061 = vmatpush.xpose.msk.msra.mxu2 %vm657_vm15, %v694_v52 }
 0x244   : > { %2060 = vmatmul.msk.f32.gmra.mxu1 %vm657_vm15, %v2490_v37 }
 0x248   : > { %v692_v55 = vpop.permute.xlu0 %691  ;;  %v1099_v56 = vpop.permute.xlu2 %1098 }
 0x249   : > { %v901_v57 = vpop.permute.xlu1 %900  ;;  %2062 = vmatpush.xpose.msk.msra.mxu2 %vm657_vm15, %v692_v55 }
 0x24c   : > { %2063 = vmatmul.msk.f32.vlgmr.msra.gmra.mxu2 %vm657_vm15, %v646_v42 }
 0x24d   : > { %2073 = vmatpush.xpose.msk.msrb.mxu2 %vm657_vm15, %v903_v49 }
 0x250   : > { %v858_v58 = vpop.permute.xlu0 %857  ;;  %v1264_v59 = vpop.permute.xlu2 %1263 }
 0x251   : > { %2074 = vmatpush.xpose.msk.msrb.mxu2 %vm657_vm15, %v901_v57  ;;  %v1060_v60 = vpop.permute.xlu1 %1059  ;;  %2071 = vmatmul.msk.f32.vlgmr.msrb.gmra.mxu1 %vm657_vm15, %v858_v58 }
 0x254   : > { %2064 = vmatmul.msk.f32.gmra.mxu2 %vm657_vm15, %v2494_v41 }
 0x258   : > { %v1066_v61 = vpop.permute.xlu0 %1065  ;;  %v1301_v62 = vpop.permute.xlu2 %1300 }
 0x259   : > { %v1105_v63 = vpop.permute.xlu1 %1104  ;;  %2072 = vmatmul.msk.f32.gmra.mxu1 %vm657_vm15, %v860_v54 }
 0x25a   : > { %2081 = vmatpush.xpose.msk.msra.mxu1 %vm657_vm15, %v1066_v61  ;;  %2085 = vmatpush.xpose.msk.msra.mxu2 %vm657_vm15, %v1105_v63 }
 0x25e   : > { %2082 = vmatpush.xpose.msk.msra.mxu1 %vm657_vm15, %v1064_v47 }
 0x260   : > { %v897_v1 = vpop.permute.xlu0 %896  ;;  %v2170_v2 = vpop.permute.xlu2 %2169 }
 0x261   : > { %v1266_v3 = vpop.permute.xlu1 %1265  ;;  %2075 = vmatmul.msk.f32.vlgmr.msrb.gmra.mxu2 %vm657_vm15, %v897_v1  ;;  %2083 = vmatmul.msk.f32.vlgmr.msra.gmra.mxu1 %vm657_vm15, %v1060_v60  ;;  %v2171_v4 = vunpack.i.l.bf16 %v2170_v2  ;;  %v2172_v5 = vunpack.i.h.bf16 %v2170_v2 }
 0x262   : > { %2093 = vmatpush.xpose.msk.msrb.mxu1 %vm657_vm15, %v1268_v50 }
 0x263   : > { %848 = vmatpush.msra.mxu3 %v2171_v4 }
 0x265   : > { %849 = vmatpush.msra.mxu3 %v2172_v5 }
 0x266   : > { %2094 = vmatpush.xpose.msk.msrb.mxu1 %vm657_vm15, %v1266_v3 }
 0x268   : > { %v1062_v6 = vpop.permute.xlu0 %1061 }
 0x269   : > { %v1101_v7 = vpop.permute.xlu1 %1100  ;;  %2076 = vmatmul.msk.f32.gmra.mxu2 %vm657_vm15, %v899_v53  ;;  %2084 = vmatmul.msk.f32.gmra.mxu1 %vm657_vm15, %v1062_v6 }
 0x270   : > { %v1103_v8 = vpop.permute.xlu0 %1102 }
 0x271   : > { %v1305_v9 = vpop.permute.xlu1 %1304  ;;  %2086 = vmatpush.xpose.msk.msra.mxu2 %vm657_vm15, %v1103_v8 }
 0x274   : > { %2087 = vmatmul.msk.f32.vlgmr.msra.gmra.mxu2 %vm657_vm15, %v1099_v56 }
 0x278   : > { %v1262_v10 = vpop.permute.xlu0 %1261 }
 0x279   : > { %v2160_v11 = vpop.permute.xlu1 %2159  ;;  %2095 = vmatmul.msk.f32.vlgmr.msrb.gmra.mxu1 %vm657_vm15, %v1262_v10 }
 0x27a   : > { %v2161_v12 = vunpack.i.l.bf16 %v2160_v11  ;;  %v2162_v13 = vunpack.i.h.bf16 %v2160_v11 }
 0x27c   : > { %1015 = vmatpush.msrb.mxu3 %v2161_v12  ;;  %2088 = vmatmul.msk.f32.gmra.mxu2 %vm657_vm15, %v1101_v7 }
 0x27e   : > { %1016 = vmatpush.msrb.mxu3 %v2162_v13 }
 0x280   : > { %v1307_v14 = vpop.permute.xlu0 %1306 }
 0x281   : > { %2096 = vmatmul.msk.f32.gmra.mxu1 %vm657_vm15, %v1264_v59  ;;  %2097 = vmatpush.xpose.msk.msrb.mxu2 %vm657_vm15, %v1307_v14 }
 0x285   : > { %2098 = vmatpush.xpose.msk.msrb.mxu2 %vm657_vm15, %v1305_v9 }
 0x288   : > { %v1303_v15 = vpop.permute.xlu0 %1302  ;;  %2099 = vmatmul.msk.f32.vlgmr.msrb.gmra.mxu2 %vm657_vm15, %v1301_v62 }
 0x290   : > { %v2165_v16 = vpop.permute.xlu0 %2164  ;;  %2100 = vmatmul.msk.f32.gmra.mxu2 %vm657_vm15, %v1303_v15 }
 0x291   : > { %v2166_v17 = vunpack.i.l.bf16 %v2165_v16  ;;  %v2167_v0 = vunpack.i.h.bf16 %v2165_v16 }
 0x293   : > { %813 = vmatpush.msrb.mxu0 %v2166_v17 }
 0x295   : > { %814 = vmatpush.msrb.mxu0 %v2167_v0 }
 0x2b9   : > { %v683_v19 = vpop.f32.mrf.mxu1 }
 0x2ba   : > { %v726_v20 = vmul.f32 0.35355338, %v683_v19 }
 0x2bc   : > { %v2558_v21 = vadd.f32 %v2555_v18, %v726_v20 }
 0x2be   : > { %v741_v22 = vsel %vm740_vm0, %v2558_v21, -inf }
 0x2bf   : > { %742 = vmax.xlane.f32.xlu2 %v741_v22 }
 0x2c1   : > { %v686_v23 = vpop.f32.mrf.mxu1 }
 0x2c2   : > { %v727_v24 = vmul.f32 0.35355338, %v686_v23 }
 0x2c4   : > { %v2563_v25 = vadd.f32 %v2555_v18, %v727_v24 }
 0x2c6   : > { %v744_v26 = vsel %vm740_vm0, %v2563_v25, -inf }
 0x2c7   : > { %745 = vmax.xlane.f32.xlu2 %v744_v26 }
 0x2ce   : > { %v890_v27 = vpop.f32.mrf.mxu1 }
 0x2cf   : > { %v935_v29 = vmul.f32 0.35355338, %v890_v27  ;;  %v720_v30 = vpop.f32.mrf.mxu2 }
 0x2d0   : > { %v728_v31 = vmul.f32 0.35355338, %v720_v30 }
 0x2d1   : > { %v2573_v32 = vadd.f32 %v2555_v18, %v935_v29 }
 0x2d2   : > { %v2576_v33 = vadd.f32 %v2570_v28, %v728_v31 }
 0x2d3   : > { %v943_v34 = vsel %vm740_vm0, %v2573_v32, -inf }
 0x2d4   : > { %944 = vmax.xlane.f32.xlu0 %v943_v34  ;;  %v747_v35 = vsel %vm740_vm0, %v2576_v33, -inf }
 0x2d5   : > { %748 = vmax.xlane.f32.xlu1 %v747_v35 }
 0x2d6   : > { %v893_v36 = vpop.f32.mrf.mxu1 }
 0x2d7   : > { %v936_v37 = vmul.f32 0.35355338, %v893_v36  ;;  %v723_v38 = vpop.f32.mrf.mxu2 }
 0x2d8   : > { %v729_v39 = vmul.f32 0.35355338, %v723_v38 }
 0x2d9   : > { %v2583_v40 = vadd.f32 %v2555_v18, %v936_v37 }
 0x2da   : > { %v2586_v41 = vadd.f32 %v2570_v28, %v729_v39 }
 0x2db   : > { %v946_v42 = vsel %vm740_vm0, %v2583_v40, -inf }
 0x2dc   : > { %v750_v45 = vsel %vm740_vm0, %v2586_v41, -inf }
 0x2dd   : > { %751 = vmax.xlane.f32.xlu2 %v750_v45  ;;  %947 = vmax.xlane.f32.xlu1 %v946_v42 }
 0x2de   : > { %v1092_v46 = vpop.f32.mrf.mxu1 }
 0x2df   : > { %v1137_v47 = vmul.f32 0.35355338, %v1092_v46 }
 0x2e1   : > { %v2593_v48 = vadd.f32 %v2555_v18, %v1137_v47 }
 0x2e3   : > { %v1145_v49 = vsel %vm740_vm0, %v2593_v48, -inf }
 0x2e4   : > { %v929_v50 = vpop.f32.mrf.mxu2  ;;  %1146 = vmax.xlane.f32.xlu0 %v1145_v49 }
 0x2e5   : > { %v937_v51 = vmul.f32 0.35355338, %v929_v50 }
 0x2e6   : > { %v1095_v52 = vpop.f32.mrf.mxu1 }
 0x2e7   : > { %v1138_v53 = vmul.f32 0.35355338, %v1095_v52  ;;  %v2598_v54 = vadd.f32 %v2570_v28, %v937_v51 }
 0x2e9   : > { %v949_v55 = vsel %vm740_vm0, %v2598_v54, -inf  ;;  %v2603_v56 = vadd.f32 %v2555_v18, %v1138_v53 }
 0x2ea   : > { %950 = vmax.xlane.f32.xlu1 %v949_v55 }
 0x2eb   : > { %v1148_v57 = vsel %vm740_vm0, %v2603_v56, -inf }
 0x2ec   : > { %v932_v58 = vpop.f32.mrf.mxu2  ;;  %1149 = vmax.xlane.f32.xlu2 %v1148_v57 }
 0x2ed   : > { %v938_v59 = vmul.f32 0.35355338, %v932_v58 }
 0x2ef   : > { %v2608_v60 = vadd.f32 %v2570_v28, %v938_v59 }
 0x2f1   : > { %v952_v61 = vsel %vm740_vm0, %v2608_v60, -inf }
 0x2f2   : > { %953 = vmax.xlane.f32.xlu0 %v952_v61 }
 0x2f6   : > { %v1294_v62 = vpop.f32.mrf.mxu1 }
 0x2f7   : > { %v1339_v63 = vmul.f32 0.35355338, %v1294_v62  ;;  %v1131_v1 = vpop.f32.mrf.mxu2 }
 0x2f8   : > { %v1139_v2 = vmul.f32 0.35355338, %v1131_v1 }
 0x2f9   : > { %v2613_v3 = vadd.f32 %v2555_v18, %v1339_v63 }
 0x2fa   : > { %v2616_v4 = vadd.f32 %v2570_v28, %v1139_v2 }
 0x2fb   : > { %v1347_v5 = vsel %vm740_vm0, %v2613_v3, -inf }
 0x2fc   : > { %1348 = vmax.xlane.f32.xlu1 %v1347_v5  ;;  %v1151_v6 = vsel %vm740_vm0, %v2616_v4, -inf }
 0x2fd   : > { %1152 = vmax.xlane.f32.xlu0 %v1151_v6 }
 0x2fe   : > { %v1297_v7 = vpop.f32.mrf.mxu1 }
 0x2ff   : > { %v1340_v8 = vmul.f32 0.35355338, %v1297_v7  ;;  %v1134_v9 = vpop.f32.mrf.mxu2 }
 0x300   : > { %v1140_v11 = vmul.f32 0.35355338, %v1134_v9 }
 0x301   : > { %v2623_v10 = vadd.f32 %v2555_v18, %v1340_v8 }
 0x302   : > { %v2628_v13 = vadd.f32 %v2570_v28, %v1140_v11 }
 0x303   : > { %v1350_v12 = vsel %vm740_vm0, %v2623_v10, -inf }
 0x304   : > { %1351 = vmax.xlane.f32.xlu1 %v1350_v12  ;;  %v1154_v15 = vsel %vm740_vm0, %v2628_v13, -inf }
 0x30b   : > { %v1333_v14 = vpop.f32.mrf.mxu2 }
 0x30c   : > { %v1341_v16 = vmul.f32 0.35355338, %v1333_v14  ;;  %1155 = vmax.xlane.f32.xlu1 %v1154_v15 }
 0x30e   : > { %v2633_v17 = vadd.f32 %v2570_v28, %v1341_v16 }
 0x310   : > { %v1353_v18 = vsel %vm740_vm0, %v2633_v17, -inf }
 0x313   : > { %v1336_v0 = vpop.f32.mrf.mxu2 }
 0x314   : > { %v1342_v19 = vmul.f32 0.35355338, %v1336_v0  ;;  %1354 = vmax.xlane.f32.xlu1 %v1353_v18 }
 0x316   : > { %v2638_v20 = vadd.f32 %v2570_v28, %v1342_v19 }
 0x318   : > { %v1356_v22 = vsel %vm740_vm0, %v2638_v20, -inf }
 0x319   : > { %1357 = vmax.xlane.f32.xlu0 %v1356_v22 }
 0x332   : > { %v743_v23 = vpop.xlane.xlu2 %742 }
 0x333   : > { %v753_v24 = vsub.f32 %v2558_v21, %v743_v23 }
 0x335   : > { %v757_v26 = vmul.f32 1.442695, %v753_v24 }
 0x337   : > { %2202 = vpow2.f32 %v757_v26 }
 0x33a   : > { %v746_v27 = vpop.xlane.xlu2 %745 }
 0x33b   : > { %v754_v29 = vsub.f32 %v2563_v25, %v746_v27 }
 0x33d   : > { %v2644_v30 = vpop.eup %2202  ;;  %v759_v31 = vmul.f32 1.442695, %v754_v29 }
 0x33e   : > { %v765_v34 = vsel %vm740_vm0, %v2644_v30, 0.0 }
 0x33f   : > { %2204 = vpow2.f32 %v759_v31  ;;  %766 = vadd.xlane.f32.xlu0 %v765_v34 }
 0x345   : > { %v2648_v28 = vpop.eup %2204 }
 0x346   : > { %v768_v35 = vsel %vm740_vm0, %v2648_v28, 0.0 }
 0x347   : > { %v945_v36 = vpop.xlane.xlu0 %944  ;;  %769 = vadd.xlane.f32.xlu1 %v768_v35 }
 0x348   : > { %v955_v21 = vsub.f32 %v2573_v32, %v945_v36  ;;  %v749_v37 = vpop.xlane.xlu1 %748 }
 0x349   : > { %v755_v25 = vsub.f32 %v2576_v33, %v749_v37 }
 0x34a   : > { %v959_v38 = vmul.f32 1.442695, %v955_v21 }
 0x34b   : > { %v761_v39 = vmul.f32 1.442695, %v755_v25 }
 0x34c   : > { %2206 = vpow2.f32 %v959_v38 }
 0x34d   : > { %2208 = vpow2.f32 %v761_v39 }
 0x350   : > { %v752_v42 = vpop.xlane.xlu2 %751  ;;  %v948_v63 = vpop.xlane.xlu1 %947 }
 0x351   : > { %v756_v45 = vsub.f32 %v2586_v41, %v752_v42  ;;  %v956_v1 = vsub.f32 %v2583_v40, %v948_v63 }
 0x352   : > { %v2655_v46 = vpop.eup %2206 }
 0x353   : > { %v2657_v47 = vpop.eup %2208  ;;  %v763_v49 = vmul.f32 1.442695, %v756_v45  ;;  %v967_v50 = vsel %vm740_vm0, %v2655_v46, 0.0  ;;  %v961_v5 = vmul.f32 1.442695, %v956_v1 }
 0x354   : > { %968 = vadd.xlane.f32.xlu0 %v967_v50  ;;  %v771_v32 = vsel %vm740_vm0, %v2657_v47, 0.0 }
 0x355   : > { %2210 = vpow2.f32 %v763_v49  ;;  %772 = vadd.xlane.f32.xlu2 %v771_v32 }
 0x357   : > { %v1147_v33 = vpop.xlane.xlu0 %1146 }
 0x358   : > { %v1157_v51 = vsub.f32 %v2593_v48, %v1147_v33 }
 0x35a   : > { %v1161_v52 = vmul.f32 1.442695, %v1157_v51 }
 0x35b   : > { %v2664_v53 = vpop.eup %2210 }
 0x35c   : > { %2212 = vpow2.f32 %v1161_v52  ;;  %v774_v41 = vsel %vm740_vm0, %v2664_v53, 0.0 }
 0x35d   : > { %775 = vadd.xlane.f32.xlu0 %v774_v41 }
 0x35f   : > { %v1150_v55 = vpop.xlane.xlu2 %1149 }
 0x360   : > { %v1158_v57 = vsub.f32 %v2603_v56, %v1150_v55  ;;  %v951_v56 = vpop.xlane.xlu1 %950 }
 0x361   : > { %v957_v6 = vsub.f32 %v2598_v54, %v951_v56 }
 0x362   : > { %v2669_v58 = vpop.eup %2212  ;;  %v1163_v59 = vmul.f32 1.442695, %v1158_v57 }
 0x363   : > { %v1169_v61 = vsel %vm740_vm0, %v2669_v58, 0.0  ;;  %v963_v9 = vmul.f32 1.442695, %v957_v6 }
 0x364   : > { %2214 = vpow2.f32 %v1163_v59 }
 0x365   : > { %1170 = vadd.xlane.f32.xlu0 %v1169_v61  ;;  %2216 = vpow2.f32 %v961_v5  ;;  %v954_v7 = vpop.xlane.xlu0 %953 }
 0x366   : > { %v958_v11 = vsub.f32 %v2608_v60, %v954_v7  ;;  %2218 = vpow2.f32 %v963_v9 }
 0x368   : > { %v965_v14 = vmul.f32 1.442695, %v958_v11 }
 0x36a   : > { %v2673_v48 = vpop.eup %2214  ;;  %2220 = vpow2.f32 %v965_v14 }
 0x36b   : > { %v1172_v62 = vsel %vm740_vm0, %v2673_v48, 0.0  ;;  %v2686_v12 = vpop.eup %2216 }
 0x36c   : > { %1173 = vadd.xlane.f32.xlu1 %v1172_v62  ;;  %v970_v40 = vsel %vm740_vm0, %v2686_v12, 0.0  ;;  %v2692_v18 = vpop.eup %2218 }
 0x36d   : > { %2174 = vrot.lane.b32.xlu2 %v2510_v44, %s2314_s22 }
 0x36f   : > { %v1349_v2 = vpop.xlane.xlu1 %1348 }
 0x370   : > { %v1153_v15 = vpop.xlane.xlu0 %1152  ;;  %v2698_v23 = vpop.eup %2220 }
 0x371   : > { %v1159_v54 = vsub.f32 %v2616_v4, %v1153_v15  ;;  %v976_v29 = vsel %vm740_vm0, %v2698_v23, 0.0 }
 0x373   : > { %v1165_v19 = vmul.f32 1.442695, %v1159_v54 }
 0x377   : > { %v1352_v8 = vpop.xlane.xlu1 %1351 }
 0x378   : > { %v1360_v22 = vsub.f32 %v2623_v10, %v1352_v8 }
 0x379   : > { %2184 = vrot.lane.b32.xlu0 %v2510_v44, %s2315_s13  ;;  %v1359_v44 = vsub.f32 %v2613_v3, %v1349_v2  ;;  %v973_v3 = vsel %vm740_vm0, %v2692_v18, 0.0 }
 0x37a   : > { %v1365_v26 = vmul.f32 1.442695, %v1360_v22 }
 0x37b   : > { %v1363_v16 = vmul.f32 1.442695, %v1359_v44 }
 0x37d   : > { %2222 = vpow2.f32 %v1363_v16 }
 0x37e   : > { %2224 = vpow2.f32 %v1165_v19 }
 0x37f   : > { %v1156_v0 = vpop.xlane.xlu1 %1155 }
 0x380   : > { %v1160_v60 = vsub.f32 %v2628_v13, %v1156_v0 }
 0x382   : > { %v1167_v24 = vmul.f32 1.442695, %v1160_v60 }
 0x383   : > { %v2700_v27 = vpop.eup %2222 }
 0x384   : > { %2226 = vpow2.f32 %v1167_v24  ;;  %v1371_v13 = vsel %vm740_vm0, %v2700_v27, 0.0  ;;  %v2707_v31 = vpop.eup %2224 }
 0x385   : > { %2179 = vrot.lane.b32.xlu1 %v2507_v43, %s2313_s23  ;;  %2228 = vpow2.f32 %v1365_v26  ;;  %v1175_v36 = vsel %vm740_vm0, %v2707_v31, 0.0 }
 0x387   : > { %v1355_v25 = vpop.xlane.xlu1 %1354 }
 0x388   : > { %v1361_v56 = vsub.f32 %v2633_v17, %v1355_v25 }
 0x38a   : > { %v2709_v35 = vpop.eup %2226 }
 0x38b   : > { %v2713_v21 = vpop.eup %2228  ;;  %v1178_v37 = vsel %vm740_vm0, %v2709_v35, 0.0 }
 0x38c   : > { %v1358_v4 = vpop.xlane.xlu0 %1357 }
 0x38d   : > { %v1362_v10 = vsub.f32 %v2638_v20, %v1358_v4  ;;  %v1374_v20 = vsel %vm740_vm0, %v2713_v21, 0.0 }
 0x38f   : > { %v1369_v34 = vmul.f32 1.442695, %v1362_v10 }
 0x391   : > { %2230 = vpow2.f32 %v1369_v34 }
 0x396   : > { %971 = vadd.xlane.f32.xlu2 %v970_v40 }
 0x397   : > { %v2719_v39 = vpop.eup %2230 }
 0x398   : > { %v1380_v42 = vsel %vm740_vm0, %v2719_v39, 0.0 }
 0x39e   : > { %974 = vadd.xlane.f32.xlu2 %v973_v3 }
 0x3a3   : > { %977 = vadd.xlane.f32.xlu0 %v976_v29 }
 0x3a6   : > { %1372 = vadd.xlane.f32.xlu2 %v1371_v13 }
 0x3ab   : > { %1176 = vadd.xlane.f32.xlu0 %v1175_v36 }
 0x3ae   : > { %1179 = vadd.xlane.f32.xlu2 %v1178_v37 }
 0x3af   : > { %1375 = vadd.xlane.f32.xlu1 %v1374_v20 }
 0x3b2   : > { %v767_v38 = vpop.xlane.xlu0 %766 }
 0x3b3   : > { %2232 = vrcp.f32 %v767_v38 }
 0x3b7   : > { %1381 = vadd.xlane.f32.xlu1 %v1380_v42 }
 0x3b9   : > { %v2233_v45 = vpop.eup %2232 }
 0x3ba   : > { %v770_v49 = vpop.xlane.xlu1 %769  ;;  %v781_v50 = vmul.f32 %v2233_v45, %v2644_v30 }
 0x3bb   : > { %2234 = vrcp.f32 %v770_v49 }
 0x3bc   : > { %2065 = vmatmul.msk.f32.vlgmr.msrb.gmra.mxu0 %vm740_vm0, %v781_v50 }
 0x3bf   : > { %2189 = vrot.lane.b32.xlu0 %v2507_v43, %s2314_s22 }
 0x3c1   : > { %v2235_v32 = vpop.eup %2234 }
 0x3c2   : > { %v782_v33 = vmul.f32 %v2235_v32, %v2648_v28 }
 0x3c4   : > { %2066 = vmatmul.msk.f32.gmra.mxu0 %vm740_vm0, %v782_v33 }
 0x3c6   : > { %2194 = vrot.lane.b32.xlu2 %v2507_v43, %s2315_s13 }
 0x3c7   : > { %v969_v51 = vpop.xlane.xlu0 %968 }
 0x3c8   : > { %2236 = vrcp.f32 %v969_v51  ;;  %v773_v52 = vpop.xlane.xlu2 %772 }
 0x3c9   : > { %2238 = vrcp.f32 %v773_v52 }
 0x3ce   : > { %v2237_v41 = vpop.eup %2236 }
 0x3cf   : > { %v2239_v30 = vpop.eup %2238  ;;  %v983_v55 = vmul.f32 %v2237_v41, %v2655_v46 }
 0x3d0   : > { %v776_v57 = vpop.xlane.xlu0 %775  ;;  %v2175_v59 = vpop.permute.xlu2 %2174  ;;  %v2733_v61 = vmul.f32 %v2239_v30, %v2657_v47  ;;  %v1367_v47 = vmul.f32 1.442695, %v1361_v56 }
 0x3d1   : > { %2240 = vrcp.f32 %v776_v57  ;;  %v2176_v28 = vunpack.i.l.bf16 %v2175_v59  ;;  %v987_v62 = vadd.f32 %v983_v55, %v781_v50  ;;  %v2177_v43 = vunpack.i.h.bf16 %v2175_v59 }
 0x3d2   : > { %2067 = vmatmul.msk.f32.vlgmr.msra.gmra.mxu3 %vm740_vm0, %v2733_v61 }
 0x3d3   : > { %1217 = vmatpush.msra.mxu3 %v2176_v28 }
 0x3d5   : > { %1218 = vmatpush.msra.mxu3 %v2177_v43 }
 0x3d7   : > { %v2241_v63 = vpop.eup %2240 }
 0x3d8   : > { %v1171_v1 = vpop.xlane.xlu0 %1170  ;;  %v784_v46 = vmul.f32 %v2241_v63, %v2664_v53 }
 0x3d9   : > { %2242 = vrcp.f32 %v1171_v1 }
 0x3da   : > { %2068 = vmatmul.msk.f32.gmra.mxu3 %vm740_vm0, %v784_v46  ;;  %2244 = vpow2.f32 %v1367_v47 }
 0x3df   : > { %v2243_v2 = vpop.eup %2242  ;;  %v1174_v11 = vpop.xlane.xlu1 %1173 }
 0x3e0   : > { %v1185_v5 = vmul.f32 %v2243_v2, %v2669_v58  ;;  %v2742_v7 = vpop.eup %2244 }
 0x3e1   : > { %v1377_v8 = vsel %vm740_vm0, %v2742_v7, 0.0 }
 0x3e2   : > { %2077 = vmatmul.msk.f32.vlgmr.msrb.gmra.mxu3 %vm740_vm0, %v983_v55  ;;  %v1189_v6 = vadd.f32 %v1185_v5, %v987_v62 }
 0x3e9   : > { %1378 = vadd.xlane.f32.xlu0 %v1377_v8 }
 0x3eb   : > { %v2185_v17 = vpop.permute.xlu0 %2184 }
 0x3ec   : > { %v2186_v9 = vunpack.i.l.bf16 %v2185_v17  ;;  %v2187_v53 = vunpack.i.h.bf16 %v2185_v17  ;;  %v1524_v17 = vld [vmem:[%s2412_s12] sm:$0xff] }
 0x3ee   : > { %1419 = vmatpush.msrb.mxu3 %v2186_v9 }
 0x3f0   : > { %1420 = vmatpush.msrb.mxu3 %v2187_v53 }
 0x3f7   : > { %v2180_v44 = vpop.permute.xlu1 %2179 }
 0x3f8   : > { %v2181_v14 = vunpack.i.l.bf16 %v2180_v44  ;;  %v2182_v40 = vunpack.i.h.bf16 %v2180_v44 }
 0x3fa   : > { %1050 = vmatpush.msra.mxu0 %v2181_v14 }
 0x3fc   : > { %1051 = vmatpush.msra.mxu0 %v2182_v40 }
 0x409   : > { %v972_v58 = vpop.xlane.xlu2 %971 }
 0x40a   : > { %2246 = vrcp.f32 %v972_v58 }
 0x410   : > { %v2247_v15 = vpop.eup %2246 }
 0x411   : > { %v975_v16 = vpop.xlane.xlu2 %974  ;;  %v984_v54 = vmul.f32 %v2247_v15, %v2686_v12 }
 0x412   : > { %2248 = vrcp.f32 %v975_v16 }
 0x413   : > { %2078 = vmatmul.msk.f32.gmra.mxu3 %vm740_vm0, %v984_v54  ;;  %2250 = vrcp.f32 %v1174_v11 }
 0x416   : > { %v978_v0 = vpop.xlane.xlu0 %977 }
 0x417   : > { %2252 = vrcp.f32 %v978_v0 }
 0x418   : > { %v2249_v60 = vpop.eup %2248 }
 0x419   : > { %v985_v19 = vmul.f32 %v2249_v60, %v2692_v18  ;;  %v1373_v22 = vpop.xlane.xlu2 %1372  ;;  %v2251_v3 = vpop.eup %2250 }
 0x41a   : > { %2254 = vrcp.f32 %v1373_v22  ;;  %v1186_v10 = vmul.f32 %v2251_v3, %v2673_v48 }
 0x41b   : > { %2079 = vmatmul.msk.f32.vlgmr.msra.gmra.mxu0 %vm740_vm0, %v985_v19  ;;  %2089 = vmatmul.msk.f32.vlgmr.msra.gmra.mxu3 %vm740_vm0, %v1185_v5  ;;  %v988_v36 = vadd.f32 %v985_v19, %v2733_v61  ;;  %v1527_v5 = vld [vmem:[%s2412_s12 + $0x18] sm:$0xff] }
 0x41c   : > { %1553 = vmatpush.msra.mxu1 %v1527_v5 }
 0x41d   : > { %v2253_v24 = vpop.eup %2252 }
 0x41e   : > { %v1177_v26 = vpop.xlane.xlu0 %1176  ;;  %v986_v29 = vmul.f32 %v2253_v24, %v2698_v23 }
 0x41f   : > { %2256 = vrcp.f32 %v1177_v26 }
 0x420   : > { %v2255_v12 = vpop.eup %2254 }
 0x421   : > { %v1387_v4 = vmul.f32 %v2255_v12, %v2700_v27  ;;  %v1180_v25 = vpop.xlane.xlu2 %1179 }
 0x422   : > { %v1376_v34 = vpop.xlane.xlu1 %1375 }
 0x423   : > { %v2754_v13 = vadd.f32 %v1387_v4, %v1189_v6  ;;  %2080 = vmatmul.msk.f32.gmra.mxu0 %vm740_vm0, %v986_v29  ;;  %2090 = vmatmul.msk.f32.gmra.mxu3 %vm740_vm0, %v1186_v10  ;;  %2258 = vrcp.f32 %v1376_v34  ;;  %v1526_v6 = vld [vmem:[%s2412_s12 + $0x10] sm:$0xff] }
 0x424   : > { %2260 = vrcp.f32 %v1180_v25  ;;  %1554 = vmatpush.msra.mxu1 %v1526_v6 }
 0x425   : > { %v2257_v18 = vpop.eup %2256 }
 0x426   : > { %v1187_v37 = vmul.f32 %v2257_v18, %v2707_v31 }
 0x428   : > { %v1190_v20 = vadd.f32 %v1187_v37, %v988_v36 }
 0x429   : > { %v2259_v23 = vpop.eup %2258  ;;  %v2195_v42 = vpop.permute.xlu2 %2194 }
 0x42a   : > { %v1388_v48 = vmul.f32 %v2259_v23, %v2713_v21  ;;  %v2196_v49 = vunpack.i.l.bf16 %v2195_v42  ;;  %v2197_v31 = vunpack.i.h.bf16 %v2195_v42  ;;  %v2261_v50 = vpop.eup %2260  ;;  %v1382_v52 = vpop.xlane.xlu1 %1381 }
 0x42b   : > { %2101 = vmatmul.msk.f32.vlgmr.msrb.gmra.mxu3 %vm740_vm0, %v1387_v4  ;;  %v1188_v32 = vmul.f32 %v2261_v50, %v2709_v35 }
 0x431   : > { %v2190_v27 = vpop.permute.xlu0 %2189 }
 0x432   : > { %v2191_v38 = vunpack.i.l.bf16 %v2190_v27  ;;  %v2192_v45 = vunpack.i.h.bf16 %v2190_v27 }
 0x433   : > { %2102 = vmatmul.msk.f32.gmra.mxu3 %vm740_vm0, %v1388_v48  ;;  %v2292_v48 = vld [vmem:[#allocation2] sm:$0xff] }
 0x434   : > { %1252 = vmatpush.msrb.mxu0 %v2191_v38 }
 0x436   : > { %1253 = vmatpush.msrb.mxu0 %v2192_v45 }
 0x437   : > { %2091 = vmatmul.msk.f32.vlgmr.msrb.gmra.mxu0 %vm740_vm0, %v1187_v37 }
 0x438   : > { %1454 = vmatpush.msra.mxu0 %v2196_v49 }
 0x439   : > { %v816_v28 = vpop.f32.mrf.mxu0 }
 0x43a   : > { %1455 = vmatpush.msra.mxu0 %v2197_v31  ;;  %v2293_v31 = vld [vmem:[#allocation2 + $0x8] sm:$0xff] }
 0x43f   : > { %2092 = vmatmul.msk.f32.gmra.mxu0 %vm740_vm0, %v1188_v32 }
 0x441   : > { %v819_v43 = vpop.f32.mrf.mxu0 }
 0x455   : > { %v2766_v21 = vpop.f32.mrf.mxu3 }
 0x45c   : > { %v1379_v33 = vpop.xlane.xlu0 %1378 }
 0x45d   : > { %2262 = vrcp.f32 %v1379_v33  ;;  %v2768_v51 = vpop.f32.mrf.mxu3 }
 0x45e   : > { %2264 = vrcp.f32 %v1382_v52 }
 0x463   : > { %v2263_v41 = vpop.eup %2262 }
 0x464   : > { %v1389_v30 = vmul.f32 %v2263_v41, %v2742_v7  ;;  %v2265_v35 = vpop.eup %2264  ;;  %v1525_v7 = vld [vmem:[%s2412_s12 + $0x8] sm:$0xff] }
 0x465   : > { %v1018_v55 = vpop.f32.mrf.mxu3  ;;  %v1390_v59 = vmul.f32 %v2265_v35, %v2719_v39  ;;  %1555 = vmatpush.msra.mxu1 %v1525_v7  ;;  %v2295_v35 = vld [vmem:[#allocation2 + $0x18] sm:$0xff] }
 0x466   : > { %v2771_v57 = vadd.f32 %v1389_v30, %v1190_v20  ;;  %2103 = vmatmul.msk.f32.vlgmr.msra.gmra.mxu0 %vm740_vm0, %v1389_v30  ;;  %1467 = vrot.lane.b32.xlu1 %v1018_v55, %s2316_s14  ;;  %v2799_v20 = vld [vmem:[%s2433_s30] sm:$0x3f] }
 0x467   : > { %1556 = vmatpush.msra.mxu1 %v1524_v17  ;;  %v1528_v25 = vperm.slane %v2799_v20, 0 }
 0x46e   : > { %2104 = vmatmul.msk.f32.gmra.mxu0 %vm740_vm0, %v1390_v59 }
 0x496   : > { %v1021_v61 = vpop.f32.mrf.mxu3 }
 0x497   : > { %1469 = vrot.lane.b32.xlu0 %v1021_v61, %s2316_s14 }
 0x498   : > { %v1053_v56 = vpop.f32.mrf.mxu0 }
 0x49e   : > { %v1220_v62 = vpop.f32.mrf.mxu3 }
 0x49f   : > { %1483 = vrot.lane.b32.xlu2 %v1220_v62, %s2317_s16 }
 0x4a0   : > { %v1056_v46 = vpop.f32.mrf.mxu0 }
 0x4a6   : > { %v1223_v63 = vpop.f32.mrf.mxu3 }
 0x4ae   : > { %v1422_v1 = vpop.f32.mrf.mxu3 }
 0x4af   : > { %1499 = vrot.lane.b32.xlu2 %v1422_v1, %s2318_s2 }
 0x4b4   : > { %v1255_v39 = vpop.f32.mrf.mxu0 }
 0x4b6   : > { %v1425_v47 = vpop.f32.mrf.mxu3 }
 0x4b7   : > { %1485 = vrot.lane.b32.xlu2 %v1223_v63, %s2317_s16  ;;  %1501 = vrot.lane.b32.xlu1 %v1425_v47, %s2318_s2 }
 0x4bc   : > { %v1258_v2 = vpop.f32.mrf.mxu0 }
 0x4bf   : > { %1471 = vrot.lane.b32.xlu2 %v1053_v56, %s2316_s14  ;;  %1487 = vrot.lane.b32.xlu1 %v1255_v39, %s2317_s16 }
 0x4c7   : > { %1473 = vrot.lane.b32.xlu2 %v1056_v46, %s2316_s14  ;;  %1489 = vrot.lane.b32.xlu1 %v1258_v2, %s2317_s16 }
 0x4d8   : > { %v1468_v11 = vpop.permute.xlu1 %1467 }
 0x4d9   : > { %v1511_v44 = vsel %vm657_vm15, %v816_v28, %v1468_v11  ;;  %v2319_v28 = vmov 32.0  }
 0x4da   : > { %2266 = vrcp.f32 %v2319_v28 }
 0x4e0   : > { %v2267_v62 = vpop.eup %2266 }
 0x4e1   : > { %vm1591_vm2 = vweird.f32 %v2267_v62 }
 0x4e3   : > { %v1457_v8 = vpop.f32.mrf.mxu0 }
 0x4e4   : > { %1503 = vrot.lane.b32.xlu0 %v1457_v8, %s2318_s2 }
 0x4eb   : > { %v1460_v9 = vpop.f32.mrf.mxu0 }
 0x4ec   : > { %1505 = vrot.lane.b32.xlu0 %v1460_v9, %s2318_s2 }
 0x4f9   : > { %v1484_v53 = vpop.permute.xlu2 %1483 }
 0x4fa   : > { %v1515_v14 = vsel %vm740_vm0, %v1511_v44, %v1484_v53 }
 0x509   : > { %v1500_v40 = vpop.permute.xlu2 %1499  ;;  %v1470_v15 = vpop.permute.xlu0 %1469 }
 0x50a   : > { %v1520_v58 = vsel %vm1519_vm1, %v1515_v14, %v1500_v40  ;;  %v1512_v54 = vsel %vm657_vm15, %v819_v43, %v1470_v15  ;;  %v1587_v43 = vmul.f32 32.0, %v2267_v62 }
 0x50b   : > { %2105 = vmatmul.msk.f32.vlgmr.msra.gmra.mxu1 %vm609_vm14, %v1520_v58 }
 0x50c   : > { %v1588_v63 = vsub.f32 1.0, %v1587_v43 }
 0x50e   : > { %v1589_v56 = vmul.f32 %v2267_v62, %v1588_v63 }
 0x510   : > { %v1590_v1 = vadd.f32 %v2267_v62, %v1589_v56 }
 0x511   : > { %v1486_v16 = vpop.permute.xlu2 %1485 }
 0x512   : > { %v1516_v0 = vsel %vm740_vm0, %v1512_v54, %v1486_v16  ;;  %v2806_v46 = vsel %vm1591_vm2, %v2267_v62, %v1590_v1 }
 0x519   : > { %v1472_v22 = vpop.permute.xlu2 %1471 }
 0x51a   : > { %v1513_v24 = vsel %vm657_vm15, %v2766_v21, %v1472_v22  ;;  %v1681_v22 = vld [vmem:[%s2417_s15 + $0x10] sm:$0xff] }
 0x521   : > { %v1474_v29 = vpop.permute.xlu2 %1473 }
 0x522   : > { %v1514_v18 = vsel %vm657_vm15, %v2768_v51, %v1474_v29  ;;  %v2294_v51 = vld [vmem:[#allocation2 + $0x10] sm:$0xff] }
 0x529   : > { %v1502_v60 = vpop.permute.xlu1 %1501 }
 0x52a   : > { %v1521_v19 = vsel %vm1519_vm1, %v1516_v0, %v1502_v60 }
 0x52b   : > { %2106 = vmatmul.msk.f32.gmra.mxu1 %vm609_vm14, %v1521_v19  ;;  %v1682_v19 = vld [vmem:[%s2417_s15 + $0x18] sm:$0xff] }
 0x52c   : > { %1711 = vmatpush.msra.mxu2 %v1682_v19  ;;  %v1770_v19 = vld [vmem:[%s2428_s27 + $0x30] sm:$0xff] }
 0x52e   : > { %1712 = vmatpush.msra.mxu2 %v1681_v22  ;;  %v1769_v22 = vld [vmem:[%s2428_s27 + $0x28] sm:$0xff] }
 0x531   : > { %v1488_v3 = vpop.permute.xlu1 %1487 }
 0x532   : > { %v1517_v26 = vsel %vm740_vm0, %v1513_v24, %v1488_v3  ;;  %v1680_v3 = vld [vmem:[%s2417_s15 + $0x8] sm:$0xff]  ;;  %v1679_v24 = vld [vmem:[%s2417_s15] sm:$0xff] }
 0x533   : > { %1713 = vmatpush.msra.mxu2 %v1680_v3  ;;  %v1768_v3 = vld [vmem:[%s2428_s27 + $0x20] sm:$0xff] }
 0x535   : > { %1714 = vmatpush.msra.mxu2 %v1679_v24  ;;  %v1767_v24 = vld [vmem:[%s2428_s27 + $0x18] sm:$0xff] }
 0x539   : > { %v1490_v10 = vpop.permute.xlu1 %1489 }
 0x53a   : > { %v1518_v34 = vsel %vm740_vm0, %v1514_v18, %v1490_v10  ;;  %vm1773_vm0 = vcmask 523264  }
 0x556   : > { %v1504_v12 = vpop.permute.xlu0 %1503 }
 0x557   : > { %v1522_v4 = vsel %vm1519_vm1, %v1517_v26, %v1504_v12 }
 0x558   : > { %2107 = vmatmul.msk.f32.gmra.mxu1 %vm609_vm14, %v1522_v4 }
 0x55e   : > { %v1506_v36 = vpop.permute.xlu0 %1505 }
 0x55f   : > { %v1523_v37 = vsel %vm1519_vm1, %v1518_v34, %v1506_v36 }
 0x560   : > { %2108 = vmatmul.msk.f32.gmra.mxu1 %vm609_vm14, %v1523_v37 }
 0x588   : > { %v1558_v23 = vpop.f32.mrf.mxu1 }
 0x589   : > { %v1559_v27 = vadd.f32 %v1558_v23, %v1528_v25 }
 0x58b   : > { %v1570_v38 = vadd.f32 %v2292_v48, %v1559_v27  ;;  %v1674_v48 = vperm.slane %v2799_v20, 2 }
 0x58d   : > { %v1574_v42 = vsel %vm609_vm14, %v1570_v38, 0.0 }
 0x58e   : > { %1575 = vadd.xlane.f32.xlu2 %v1574_v42 }
 0x5a8   : > { %v1561_v45 = vpop.f32.mrf.mxu1 }
 0x5a9   : > { %v1562_v49 = vadd.f32 %v1561_v45, %v1528_v25 }
 0x5ab   : > { %v1571_v50 = vadd.f32 %v2293_v31, %v1562_v49 }
 0x5ad   : > { %v1577_v32 = vsel %vm609_vm14, %v1571_v50, 0.0 }
 0x5ae   : > { %1578 = vadd.xlane.f32.xlu1 %v1577_v32 }
 0x5d5   : > { %v1564_v21 = vpop.f32.mrf.mxu1 }
 0x5d6   : > { %v1565_v33 = vadd.f32 %v1564_v21, %v1528_v25 }
 0x5d8   : > { %v1572_v52 = vadd.f32 %v2294_v51, %v1565_v33 }
 0x5da   : > { %v1580_v41 = vsel %vm609_vm14, %v1572_v52, 0.0 }
 0x5db   : > { %1581 = vadd.xlane.f32.xlu0 %v1580_v41 }
 0x5dd   : > { %v1567_v30 = vpop.f32.mrf.mxu1 }
 0x5de   : > { %v1568_v55 = vadd.f32 %v1567_v30, %v1528_v25  ;;  %v1669_v25 = vperm.slane %v2799_v20, 1 }
 0x5e0   : > { %v1573_v59 = vadd.f32 %v2295_v35, %v1568_v55 }
 0x5e2   : > { %v1583_v61 = vsel %vm609_vm14, %v1573_v59, 0.0 }
 0x5e3   : > { %1584 = vadd.xlane.f32.xlu2 %v1583_v61 }
 0x601   : > { %v1576_v47 = vpop.xlane.xlu2 %1575 }
 0x602   : > { %v1593_v39 = vmul.f32 %v2806_v46, %v1576_v47 }
 0x604   : > { %v1597_v2 = vsub.f32 %v1570_v38, %v1593_v39 }
 0x606   : > { %v1601_v5 = vmul.f32 %v1597_v2, %v1597_v2 }
 0x608   : > { %v1605_v6 = vsel %vm609_vm14, %v1601_v5, 0.0 }
 0x609   : > { %1606 = vadd.xlane.f32.xlu1 %v1605_v6 }
 0x621   : > { %v1579_v7 = vpop.xlane.xlu1 %1578 }
 0x622   : > { %v1594_v8 = vmul.f32 %v2806_v46, %v1579_v7 }
 0x624   : > { %v1598_v17 = vsub.f32 %v1571_v50, %v1594_v8 }
 0x626   : > { %v1602_v9 = vmul.f32 %v1598_v17, %v1598_v17 }
 0x628   : > { %v1608_v53 = vsel %vm609_vm14, %v1602_v9, 0.0 }
 0x629   : > { %1609 = vadd.xlane.f32.xlu0 %v1608_v53 }
 0x64e   : > { %v1582_v11 = vpop.xlane.xlu0 %1581 }
 0x64f   : > { %v1595_v44 = vmul.f32 %v2806_v46, %v1582_v11 }
 0x651   : > { %v2813_v14 = vsub.f32 %v1572_v52, %v1595_v44 }
 0x653   : > { %v1603_v40 = vmul.f32 %v2813_v14, %v2813_v14 }
 0x655   : > { %v1611_v58 = vsel %vm609_vm14, %v1603_v40, 0.0 }
 0x656   : > { %1612 = vadd.xlane.f32.xlu2 %v1611_v58  ;;  %v1585_v15 = vpop.xlane.xlu2 %1584 }
 0x657   : > { %v1596_v16 = vmul.f32 %v2806_v46, %v1585_v15 }
 0x659   : > { %v2819_v54 = vsub.f32 %v1573_v59, %v1596_v16 }
 0x65b   : > { %v1604_v0 = vmul.f32 %v2819_v54, %v2819_v54 }
 0x65d   : > { %v1614_v60 = vsel %vm609_vm14, %v1604_v0, 0.0 }
 0x65e   : > { %1615 = vadd.xlane.f32.xlu1 %v1614_v60  ;;  %v1771_v60 = vld [vmem:[%s2428_s27 + $0x38] sm:$0xff] }
 0x65f   : > { %1794 = vmatpush.msra.mxu3 %v1771_v60 }
 0x661   : > { %1795 = vmatpush.msra.mxu3 %v1770_v19 }
 0x663   : > { %1796 = vmatpush.msra.mxu3 %v1769_v22 }
 0x665   : > { %1797 = vmatpush.msra.mxu3 %v1768_v3 }
 0x667   : > { %1798 = vmatpush.msra.mxu3 %v1767_v24 }
 0x67c   : > { %v1607_v26 = vpop.xlane.xlu1 %1606 }
 0x67d   : > { %v1617_v12 = vmul.f32 %v1607_v26, %v2806_v46  ;;  %v1766_v26 = vld [vmem:[%s2428_s27 + $0x10] sm:$0xff] }
 0x67e   : > { %1799 = vmatpush.msra.mxu3 %v1766_v26 }
 0x67f   : > { %v1621_v4 = vadd.f32 1e-12, %v1617_v12  ;;  %v1764_v12 = vld [vmem:[%s2428_s27] sm:$0xff] }
 0x681   : > { %2268 = vrsqrt.f32 %v1621_v4  ;;  %vm1631_vm4 = vweird.f32 %v1621_v4 }
 0x687   : > { %v2269_v29 = vpop.eup %2268 }
 0x688   : > { %v1626_v10 = vmul.f32 %v2269_v29, %v1621_v4  ;;  %vm1632_vm3 = vweird.f32 %v2269_v29  ;;  %v2201_v4 = vld [vmem:[%s465_s20] ss:$0 sm:$0xff] }
 0x689   : > { %vm1633_vm5 = vmor %vm1631_vm4, %vm1632_vm3 }
 0x68a   : > { %v1627_v18 = vmul.f32 %v2269_v29, %v1626_v10 }
 0x68c   : > { %v1628_v34 = vmul.f32 0.5, %v1627_v18 }
 0x68e   : > { %v1629_v36 = vsub.f32 1.5, %v1628_v34 }
 0x690   : > { %v1630_v37 = vmul.f32 %v2269_v29, %v1629_v36 }
 0x692   : > { %v1634_v23 = vsel %vm1633_vm5, %v2269_v29, %v1630_v37 }
 0x693   : > { %v1665_v27 = vmul.f32 %v1634_v23, %v1597_v2 }
 0x695   : > { %v1670_v38 = vmul.f32 %v1669_v25, %v1665_v27 }
 0x697   : > { %v2831_v42 = vadd.f32 %v1674_v48, %v1670_v38 }
 0x699   : > { %2109 = vmatmul.msk.f32.vlgmr.msra.gmra.mxu2 %vm609_vm14, %v2831_v42 }
 0x69c   : > { %v1610_v45 = vpop.xlane.xlu0 %1609 }
 0x69d   : > { %v1618_v49 = vmul.f32 %v1610_v45, %v2806_v46 }
 0x69f   : > { %v1622_v31 = vadd.f32 1e-12, %v1618_v49 }
 0x6a1   : > { %2270 = vrsqrt.f32 %v1622_v31  ;;  %vm1641_vm7 = vweird.f32 %v1622_v31 }
 0x6a7   : > { %v2271_v50 = vpop.eup %2270 }
 0x6a8   : > { %v1636_v32 = vmul.f32 %v2271_v50, %v1622_v31  ;;  %vm1642_vm6 = vweird.f32 %v2271_v50 }
 0x6a9   : > { %vm1643_vm8 = vmor %vm1641_vm7, %vm1642_vm6 }
 0x6aa   : > { %v1637_v21 = vmul.f32 %v2271_v50, %v1636_v32 }
 0x6ac   : > { %v1638_v33 = vmul.f32 0.5, %v1637_v21 }
 0x6ae   : > { %v1639_v51 = vsub.f32 1.5, %v1638_v33 }
 0x6b0   : > { %v1640_v52 = vmul.f32 %v2271_v50, %v1639_v51 }
 0x6b2   : > { %v1644_v41 = vsel %vm1643_vm8, %v2271_v50, %v1640_v52 }
 0x6b3   : > { %v1666_v30 = vmul.f32 %v1644_v41, %v1598_v17 }
 0x6b5   : > { %v1671_v55 = vmul.f32 %v1669_v25, %v1666_v30 }
 0x6b7   : > { %v2836_v35 = vadd.f32 %v1674_v48, %v1671_v55 }
 0x6b9   : > { %2110 = vmatmul.msk.f32.gmra.mxu2 %vm609_vm14, %v2836_v35 }
 0x6c9   : > { %v1613_v59 = vpop.xlane.xlu2 %1612 }
 0x6ca   : > { %v1619_v61 = vmul.f32 %v1613_v59, %v2806_v46 }
 0x6cc   : > { %v1623_v28 = vadd.f32 1e-12, %v1619_v61 }
 0x6ce   : > { %2272 = vrsqrt.f32 %v1623_v28  ;;  %vm1651_vm10 = vweird.f32 %v1623_v28 }
 0x6d1   : > { %v1616_v62 = vpop.xlane.xlu1 %1615 }
 0x6d2   : > { %v1620_v43 = vmul.f32 %v1616_v62, %v2806_v46 }
 0x6d4   : > { %v2273_v63 = vpop.eup %2272  ;;  %v1624_v56 = vadd.f32 1e-12, %v1620_v43 }
 0x6d5   : > { %v1646_v1 = vmul.f32 %v2273_v63, %v1623_v28  ;;  %vm1652_vm9 = vweird.f32 %v2273_v63 }
 0x6d6   : > { %2274 = vrsqrt.f32 %v1624_v56  ;;  %vm1653_vm11 = vmor %vm1651_vm10, %vm1652_vm9  ;;  %vm1661_vm13 = vweird.f32 %v1624_v56 }
 0x6d7   : > { %v1647_v47 = vmul.f32 %v2273_v63, %v1646_v1 }
 0x6d9   : > { %v1648_v39 = vmul.f32 0.5, %v1647_v47 }
 0x6db   : > { %v1649_v2 = vsub.f32 1.5, %v1648_v39 }
 0x6dc   : > { %v2275_v5 = vpop.eup %2274 }
 0x6dd   : > { %v1650_v6 = vmul.f32 %v2273_v63, %v1649_v2  ;;  %v1656_v7 = vmul.f32 %v2275_v5, %v1624_v56  ;;  %vm1662_vm12 = vweird.f32 %v2275_v5 }
 0x6de   : > { %vm1663_vm15 = vmor %vm1661_vm13, %vm1662_vm12 }
 0x6df   : > { %v1654_v8 = vsel %vm1653_vm11, %v2273_v63, %v1650_v6  ;;  %v1657_v17 = vmul.f32 %v2275_v5, %v1656_v7 }
 0x6e0   : > { %v1667_v9 = vmul.f32 %v1654_v8, %v2813_v14 }
 0x6e1   : > { %v1658_v53 = vmul.f32 0.5, %v1657_v17 }
 0x6e2   : > { %v1672_v11 = vmul.f32 %v1669_v25, %v1667_v9 }
 0x6e3   : > { %v1659_v44 = vsub.f32 1.5, %v1658_v53 }
 0x6e4   : > { %v2843_v40 = vadd.f32 %v1674_v48, %v1672_v11 }
 0x6e5   : > { %v1660_v58 = vmul.f32 %v2275_v5, %v1659_v44 }
 0x6e6   : > { %2111 = vmatmul.msk.f32.gmra.mxu2 %vm609_vm14, %v2843_v40 }
 0x6e7   : > { %v1664_v15 = vsel %vm1663_vm15, %v2275_v5, %v1660_v58 }
 0x6e8   : > { %v1668_v14 = vmul.f32 %v1664_v15, %v2819_v54  ;;  %v1765_v54 = vld [vmem:[%s2428_s27 + $0x8] sm:$0xff]  ;;  %v1772_v15 = vperm.slane %v2799_v20, 3 }
 0x6e9   : > { %1800 = vmatpush.msra.mxu3 %v1765_v54 }
 0x6ea   : > { %v1673_v16 = vmul.f32 %v1669_v25, %v1668_v14 }
 0x6eb   : > { %1801 = vmatpush.msra.mxu3 %v1764_v12 }
 0x6ec   : > { %v2848_v0 = vadd.f32 %v1674_v48, %v1673_v16 }
 0x6ee   : > { %2112 = vmatmul.msk.f32.gmra.mxu2 %vm609_vm14, %v2848_v0 }
 0x71c   : > { %v1716_v29 = vpop.f32.mrf.mxu2 }
 0x71d   : > { %v1717_v10 = vadd.f32 %v2201_v4, %v1716_v29 }
 0x71f   : > { %v1732_v18 = vmul.f32 0.044715, %v1717_v10  ;;  %v1728_v27 = vmul.f32 0.5, %v1717_v10 }
 0x721   : > { %v1736_v34 = vmul.f32 %v1732_v18, %v1717_v10 }
 0x723   : > { %v1740_v36 = vmul.f32 %v1736_v34, %v1717_v10 }
 0x725   : > { %v1744_v37 = vadd.f32 %v1740_v36, %v1717_v10 }
 0x727   : > { %v1748_v25 = vmul.f32 0.7978846, %v1744_v37 }
 0x729   : > { %2276 = vtanh.f32 %v1748_v25 }
 0x72f   : > { %v2277_v23 = vpop.eup %2276 }
 0x730   : > { %v1756_v48 = vadd.f32 1.0, %v2277_v23 }
 0x732   : > { %v1760_v38 = vmul.f32 %v1756_v48, %v1728_v27 }
 0x734   : > { %2113 = vmatmul.msk.f32.vlgmr.msra.gmra.mxu3 %vm1773_vm0, %v1760_v38 }
 0x73c   : > { %v1719_v45 = vpop.f32.mrf.mxu2 }
 0x73d   : > { %v1720_v49 = vadd.f32 %v2201_v4, %v1719_v45 }
 0x73f   : > { %v1733_v31 = vmul.f32 0.044715, %v1720_v49  ;;  %v1729_v52 = vmul.f32 0.5, %v1720_v49 }
 0x741   : > { %v1737_v50 = vmul.f32 %v1733_v31, %v1720_v49 }
 0x743   : > { %v1741_v32 = vmul.f32 %v1737_v50, %v1720_v49 }
 0x745   : > { %v1745_v21 = vadd.f32 %v1741_v32, %v1720_v49 }
 0x747   : > { %v1749_v33 = vmul.f32 0.7978846, %v1745_v21 }
 0x749   : > { %2278 = vtanh.f32 %v1749_v33 }
 0x74f   : > { %v2279_v51 = vpop.eup %2278 }
 0x750   : > { %v1757_v41 = vadd.f32 1.0, %v2279_v51 }
 0x752   : > { %v1761_v30 = vmul.f32 %v1757_v41, %v1729_v52 }
 0x754   : > { %2114 = vmatmul.msk.f32.gmra.mxu3 %vm1773_vm0, %v1761_v30 }
 0x769   : > { %v1722_v55 = vpop.f32.mrf.mxu2 }
 0x76a   : > { %v1723_v59 = vadd.f32 %v2201_v4, %v1722_v55 }
 0x76c   : > { %v1734_v61 = vmul.f32 0.044715, %v1723_v59  ;;  %v1730_v8 = vmul.f32 0.5, %v1723_v59 }
 0x76e   : > { %v1738_v28 = vmul.f32 %v1734_v61, %v1723_v59 }
 0x770   : > { %v1742_v62 = vmul.f32 %v1738_v28, %v1723_v59 }
 0x771   : > { %v1725_v43 = vpop.f32.mrf.mxu2 }
 0x772   : > { %v1726_v63 = vadd.f32 %v2201_v4, %v1725_v43  ;;  %v1746_v56 = vadd.f32 %v1742_v62, %v1723_v59 }
 0x774   : > { %v1735_v1 = vmul.f32 0.044715, %v1726_v63  ;;  %v1750_v47 = vmul.f32 0.7978846, %v1746_v56  ;;  %v1731_v11 = vmul.f32 0.5, %v1726_v63 }
 0x776   : > { %2280 = vtanh.f32 %v1750_v47  ;;  %v1739_v39 = vmul.f32 %v1735_v1, %v1726_v63  ;;  %v1907_v1 = vperm.slane %v2799_v20, 4 }
 0x778   : > { %v1743_v2 = vmul.f32 %v1739_v39, %v1726_v63  ;;  %v1912_v39 = vperm.slane %v2799_v20, 5 }
 0x77a   : > { %v1747_v5 = vadd.f32 %v1743_v2, %v1726_v63 }
 0x77c   : > { %v2281_v6 = vpop.eup %2280  ;;  %v1751_v7 = vmul.f32 0.7978846, %v1747_v5 }
 0x77d   : > { %v1758_v17 = vadd.f32 1.0, %v2281_v6 }
 0x77e   : > { %2282 = vtanh.f32 %v1751_v7 }
 0x77f   : > { %v1762_v9 = vmul.f32 %v1758_v17, %v1730_v8 }
 0x781   : > { %2115 = vmatmul.msk.f32.gmra.mxu3 %vm1773_vm0, %v1762_v9 }
 0x784   : > { %v2283_v53 = vpop.eup %2282 }
 0x785   : > { %v1759_v44 = vadd.f32 1.0, %v2283_v53 }
 0x787   : > { %v1763_v58 = vmul.f32 %v1759_v44, %v1731_v11 }
 0x789   : > { %2116 = vmatmul.msk.f32.gmra.mxu3 %vm1773_vm0, %v1763_v58 }
 0x7b7   : > { %v1803_v14 = vpop.f32.mrf.mxu3 }
 0x7b8   : > { %v1804_v16 = vadd.f32 %v1803_v14, %v1772_v15 }
 0x7ba   : > { %v1815_v60 = vadd.f32 %v1804_v16, %v2831_v42 }
 0x7bc   : > { %v1819_v19 = vsel %vm609_vm14, %v1815_v60, 0.0 }
 0x7bd   : > { %1820 = vadd.xlane.f32.xlu0 %v1819_v19 }
 0x7d7   : > { %v1806_v22 = vpop.f32.mrf.mxu3 }
 0x7d8   : > { %v1807_v3 = vadd.f32 %v1806_v22, %v1772_v15 }
 0x7da   : > { %v1816_v24 = vadd.f32 %v1807_v3, %v2836_v35 }
 0x7dc   : > { %v1822_v26 = vsel %vm609_vm14, %v1816_v24, 0.0 }
 0x7dd   : > { %1823 = vadd.xlane.f32.xlu2 %v1822_v26 }
 0x804   : > { %v1809_v54 = vpop.f32.mrf.mxu3 }
 0x805   : > { %v1810_v12 = vadd.f32 %v1809_v54, %v1772_v15 }
 0x807   : > { %v1817_v4 = vadd.f32 %v1810_v12, %v2843_v40 }
 0x809   : > { %v1825_v29 = vsel %vm609_vm14, %v1817_v4, 0.0 }
 0x80a   : > { %1826 = vadd.xlane.f32.xlu1 %v1825_v29 }
 0x80c   : > { %v1812_v10 = vpop.f32.mrf.mxu3 }
 0x80d   : > { %v1813_v18 = vadd.f32 %v1812_v10, %v1772_v15 }
 0x80f   : > { %v1818_v42 = vadd.f32 %v1813_v18, %v2848_v0 }
 0x811   : > { %v1828_v34 = vsel %vm609_vm14, %v1818_v42, 0.0 }
 0x812   : > { %1829 = vadd.xlane.f32.xlu0 %v1828_v34 }
 0x830   : > { %v1821_v36 = vpop.xlane.xlu0 %1820 }
 0x831   : > { %v1831_v35 = vmul.f32 %v1821_v36, %v2806_v46 }
 0x833   : > { %v1835_v37 = vsub.f32 %v1815_v60, %v1831_v35 }
 0x835   : > { %v1839_v25 = vmul.f32 %v1835_v37, %v1835_v37 }
 0x837   : > { %v1843_v23 = vsel %vm609_vm14, %v1839_v25, 0.0 }
 0x838   : > { %1844 = vadd.xlane.f32.xlu2 %v1843_v23 }
 0x850   : > { %v1824_v27 = vpop.xlane.xlu2 %1823 }
 0x851   : > { %v1832_v40 = vmul.f32 %v1824_v27, %v2806_v46 }
 0x853   : > { %v1836_v48 = vsub.f32 %v1816_v24, %v1832_v40 }
 0x855   : > { %v1840_v38 = vmul.f32 %v1836_v48, %v1836_v48 }
 0x857   : > { %v1846_v45 = vsel %vm609_vm14, %v1840_v38, 0.0 }
 0x858   : > { %1847 = vadd.xlane.f32.xlu1 %v1846_v45 }
 0x87d   : > { %v1827_v0 = vpop.xlane.xlu1 %1826 }
 0x87e   : > { %v1833_v49 = vmul.f32 %v1827_v0, %v2806_v46 }
 0x880   : > { %v2883_v31 = vsub.f32 %v1817_v4, %v1833_v49 }
 0x882   : > { %v1841_v50 = vmul.f32 %v2883_v31, %v2883_v31 }
 0x884   : > { %v1849_v32 = vsel %vm609_vm14, %v1841_v50, 0.0 }
 0x885   : > { %v1830_v21 = vpop.xlane.xlu0 %1829  ;;  %1850 = vadd.xlane.f32.xlu0 %v1849_v32 }
 0x886   : > { %v1834_v33 = vmul.f32 %v1830_v21, %v2806_v46 }
 0x888   : > { %v2889_v51 = vsub.f32 %v1818_v42, %v1834_v33 }
 0x88a   : > { %v1842_v52 = vmul.f32 %v2889_v51, %v2889_v51 }
 0x88c   : > { %v1852_v41 = vsel %vm609_vm14, %v1842_v52, 0.0 }
 0x88d   : > { %1853 = vadd.xlane.f32.xlu2 %v1852_v41 }
 0x8ab   : > { %v1845_v30 = vpop.xlane.xlu2 %1844 }
 0x8ac   : > { %v1855_v55 = vmul.f32 %v1845_v30, %v2806_v46 }
 0x8ae   : > { %v1859_v59 = vadd.f32 1e-12, %v1855_v55 }
 0x8b0   : > { %2284 = vrsqrt.f32 %v1859_v59  ;;  %vm1869_vm2 = vweird.f32 %v1859_v59 }
 0x8b6   : > { %v2285_v61 = vpop.eup %2284 }
 0x8b7   : > { %v1864_v28 = vmul.f32 %v2285_v61, %v1859_v59  ;;  %vm1870_vm1 = vweird.f32 %v2285_v61 }
 0x8b8   : > { %vm1871_vm3 = vmor %vm1869_vm2, %vm1870_vm1 }
 0x8b9   : > { %v1865_v62 = vmul.f32 %v2285_v61, %v1864_v28 }
 0x8bb   : > { %v1866_v43 = vmul.f32 0.5, %v1865_v62 }
 0x8bd   : > { %v1867_v63 = vsub.f32 1.5, %v1866_v43 }
 0x8bf   : > { %v1868_v56 = vmul.f32 %v2285_v61, %v1867_v63 }
 0x8c1   : > { %v1872_v47 = vsel %vm1871_vm3, %v2285_v61, %v1868_v56 }
 0x8c2   : > { %v1903_v2 = vmul.f32 %v1872_v47, %v1835_v37 }
 0x8c4   : > { %v1908_v5 = vmul.f32 %v1907_v1, %v1903_v2 }
 0x8c6   : > { %v1913_v6 = vadd.f32 %v1912_v39, %v1908_v5 }
 0x8c8   : > { %1917 = vst.msk [vmem:[#allocation2] sm:$0xff] %vm609_vm14, %v1913_v6 }
 0x8cb   : > { %v1848_v7 = vpop.xlane.xlu1 %1847 }
 0x8cc   : > { %v1856_v8 = vmul.f32 %v1848_v7, %v2806_v46 }
 0x8ce   : > { %v1860_v17 = vadd.f32 1e-12, %v1856_v8 }
 0x8d0   : > { %2286 = vrsqrt.f32 %v1860_v17  ;;  %vm1879_vm5 = vweird.f32 %v1860_v17 }
 0x8d6   : > { %v2287_v9 = vpop.eup %2286 }
 0x8d7   : > { %v1874_v53 = vmul.f32 %v2287_v9, %v1860_v17  ;;  %vm1880_vm4 = vweird.f32 %v2287_v9 }
 0x8d8   : > { %vm1881_vm6 = vmor %vm1879_vm5, %vm1880_vm4 }
 0x8d9   : > { %v1875_v11 = vmul.f32 %v2287_v9, %v1874_v53 }
 0x8db   : > { %v1876_v44 = vmul.f32 0.5, %v1875_v11 }
 0x8dd   : > { %v1877_v58 = vsub.f32 1.5, %v1876_v44 }
 0x8df   : > { %v1878_v15 = vmul.f32 %v2287_v9, %v1877_v58 }
 0x8e1   : > { %v1882_v20 = vsel %vm1881_vm6, %v2287_v9, %v1878_v15 }
 0x8e2   : > { %v1904_v14 = vmul.f32 %v1882_v20, %v1836_v48 }
 0x8e4   : > { %v1909_v16 = vmul.f32 %v1907_v1, %v1904_v14 }
 0x8e6   : > { %v1914_v60 = vadd.f32 %v1912_v39, %v1909_v16 }
 0x8e8   : > { %1918 = vst.msk [vmem:[#allocation2 + $0x8] sm:$0xff] %vm609_vm14, %v1914_v60 }
 0x8f8   : > { %v1851_v19 = vpop.xlane.xlu0 %1850 }
 0x8f9   : > { %v1857_v22 = vmul.f32 %v1851_v19, %v2806_v46 }
 0x8fb   : > { %v1861_v3 = vadd.f32 1e-12, %v1857_v22 }
 0x8fd   : > { %2288 = vrsqrt.f32 %v1861_v3  ;;  %vm1889_vm8 = vweird.f32 %v1861_v3 }
 0x900   : > { %v1854_v24 = vpop.xlane.xlu2 %1853 }
 0x901   : > { %v1858_v26 = vmul.f32 %v1854_v24, %v2806_v46 }
 0x903   : > { %v2289_v54 = vpop.eup %2288  ;;  %v1862_v12 = vadd.f32 1e-12, %v1858_v26 }
 0x904   : > { %v1884_v4 = vmul.f32 %v2289_v54, %v1861_v3  ;;  %vm1890_vm7 = vweird.f32 %v2289_v54 }
 0x905   : > { %2290 = vrsqrt.f32 %v1862_v12  ;;  %vm1891_vm9 = vmor %vm1889_vm8, %vm1890_vm7  ;;  %vm1899_vm11 = vweird.f32 %v1862_v12 }
 0x906   : > { %v1885_v29 = vmul.f32 %v2289_v54, %v1884_v4 }
 0x908   : > { %v1886_v10 = vmul.f32 0.5, %v1885_v29 }
 0x90a   : > { %v1887_v18 = vsub.f32 1.5, %v1886_v10 }
 0x90b   : > { %v2291_v42 = vpop.eup %2290 }
 0x90c   : > { %v1888_v34 = vmul.f32 %v2289_v54, %v1887_v18  ;;  %v1894_v36 = vmul.f32 %v2291_v42, %v1862_v12  ;;  %vm1900_vm10 = vweird.f32 %v2291_v42 }
 0x90d   : > { %vm1901_vm12 = vmor %vm1899_vm11, %vm1900_vm10 }
 0x90e   : > { %v1892_v35 = vsel %vm1891_vm9, %v2289_v54, %v1888_v34  ;;  %v1895_v37 = vmul.f32 %v2291_v42, %v1894_v36 }
 0x90f   : > { %v1905_v25 = vmul.f32 %v1892_v35, %v2883_v31 }
 0x910   : > { %v1896_v23 = vmul.f32 0.5, %v1895_v37 }
 0x911   : > { %v1910_v27 = vmul.f32 %v1907_v1, %v1905_v25 }
 0x912   : > { %v1897_v46 = vsub.f32 1.5, %v1896_v23 }
 0x913   : > { %v1915_v40 = vadd.f32 %v1912_v39, %v1910_v27 }
 0x914   : > { %v1898_v48 = vmul.f32 %v2291_v42, %v1897_v46 }
 0x915   : > { %1919 = vst.msk [vmem:[#allocation2 + $0x10] sm:$0xff] %vm609_vm14, %v1915_v40 }
 0x916   : > { %v1902_v38 = vsel %vm1901_vm12, %v2291_v42, %v1898_v48 }
 0x917   : > { %v1906_v45 = vmul.f32 %v1902_v38, %v2889_v51 }
 0x919   : > { %v1911_v0 = vmul.f32 %v1907_v1, %v1906_v45  ;;  %1924 = sbr.rel (%p2117_p5) target bundleno = 2340 (0x924), region = 68 }
 0x91b   : > { %v1916_v49 = vadd.f32 %v1912_v39, %v1911_v0 }
 0x91d   : > { %1920 = vst.msk [vmem:[#allocation2 + $0x18] sm:$0xff] %vm609_vm14, %v1916_v49 }
 0x91e   : > { %1925 = vst.msk [vmem:[%s2941_s10] sm:$0xff] %vm609_vm14, %v1913_v6  ;;  %v1929_v31 = vmul.f32 0.25, %v2754_v13  ;;  %v1930_v50 = vmul.f32 0.25, %v2771_v57  ;;  %vm1934_vm13 = vcmask 1041409   ;;  %vm1937_vm15 = vcmask 123904  }
 0x91f   : > { %1926 = vst.msk [vmem:[%s2941_s10 + $0x8] sm:$0xff] %vm609_vm14, %v1914_v60 }
 0x920   : > { %1927 = vst.msk [vmem:[%s2941_s10 + $0x10] sm:$0xff] %vm609_vm14, %v1915_v40  ;;  %v1933_v32 = vrot.slane %v1930_v50, 7 }
 0x921   : > { %1928 = vst.msk [vmem:[%s2941_s10 + $0x18] sm:$0xff] %vm609_vm14, %v1916_v49 }
 0x922   : > { %v1935_v13 = vsel %vm1934_vm13, %v1933_v32, %v1929_v31 }
 0x923   : > { %1938 = vst.msk [vmem:[%s2942_s11] sm:$0x3] %vm1937_vm15, %v1935_v13 }
 0x924 PF: > { %s22_s17 = sadd.s32 1, %s2302_s17  }
 0x925   : > { %p19_p6 = scmp.ge.s32.totalorder %s22_s17, 4  }
 0x927   :  { %21 = sbr.rel (!%p19_p6) target bundleno = 2 (0x2), region = 120 }

</bundles_post_ra>
